<compile_context>
chip_gen: v7x
topology: tpu7x:2x2x1
jax: 0.10.0
libtpu: 0.0.40
codegen_flags: <defaults>
</compile_context>

<pallas_src>
import functools

import jax
import jax.numpy as jnp
import numpy as np
from jax.experimental import pallas as pl
from jax.experimental.pallas import tpu as pltpu


def _round_up(x, m):
    return ((x + m - 1) // m) * m


def clustering_kernel(logits_ref, d_ref, y_ref, s1_ref, s2_ref, count_acc,
                      *, total_rows):
    i = pl.program_id(0)
    nsteps = pl.num_programs(0)

    @pl.when(i == 0)
    def _():
        count_acc[...] = jnp.zeros_like(count_acc)

    logits = logits_ref[...]                                  # (TR, K) f32
    tr, k = logits.shape

    # argmax(softmax(x)) == argmax(x): build the hard one-hot directly from
    # the (Gumbel-perturbed) logits; first-index tie-break like torch .max().
    kiota = jax.lax.broadcasted_iota(jnp.int32, logits.shape, 1)
    max_v = jnp.max(logits, axis=-1, keepdims=True)
    first_idx = jnp.min(jnp.where(logits == max_v, kiota, k),
                        axis=-1, keepdims=True)               # (TR, 1)
    onehot = (kiota == first_idx).astype(jnp.float32)         # (TR, K)

    # Mask rows past the true R (tail tile) so padded rows contribute nothing.
    row = jax.lax.broadcasted_iota(jnp.int32, (tr, 1), 0) + i * tr
    valid = row < total_rows                                  # (TR, 1) bool
    onehot = jnp.where(valid, onehot, 0.0)
    y_ref[...] = onehot

    d = d_ref[...]                                            # (TR, C) bf16 0/1
    d = jnp.where(valid, d, jnp.zeros_like(d))

    # count[k, c] += sum_r y[r, k] * D[r, c]   (MXU, contraction over rows,
    # no explicit transpose; lane-dense (K, C) accumulator).
    count_acc[...] += jax.lax.dot_general(
        onehot.astype(jnp.bfloat16), d,
        dimension_numbers=(((0,), (0,)), ((), ())),
        preferred_element_type=jnp.float32)                   # (K, C)

    @pl.when(i == nsteps - 1)
    def _():
        cnt = count_acc[...]                                  # (K, C), exact ints
        # 1 - prod_r(1 - x) == (count > 0) because D and y are binary.
        s1_ref[...] = jnp.sum((cnt > 0.0).astype(jnp.float32),
                              axis=-1, keepdims=True)         # (K, 1)
        # sum_{r,c} x[r,c,k] == sum_c count[k,c]
        s2_ref[...] = jnp.sum(cnt, axis=-1, keepdims=True)    # (K, 1)


def clustering_forward(Y, D, key, training=True, block_rows=256):
    """Y: (R, K) logits param, D: (R, C) binary pruned 0/1 matrix."""
    R, K = Y.shape
    R2, C = D.shape
    assert R == R2
    # NOTE: the count==0 reformulation inside the kernel requires D in {0, 1}
    # (which is what prune_layer produces).

    if training:
        # GumbelSoftmax.sample_gumbel_like, generated deterministically (glue).
        eps = 1e-10
        u = jax.random.uniform(key, Y.shape, dtype=jnp.float32)
        g = -jnp.log(eps - jnp.log(u + eps))
        logits = Y + g
    else:
        logits = Y

    tr = min(block_rows, _round_up(R, 8))                     # rows per grid step
    grid = (pl.cdiv(R, tr),)

    kernel = functools.partial(clustering_kernel, total_rows=R)

    y, s1, s2 = pl.pallas_call(
        kernel,
        out_shape=(
            jax.ShapeDtypeStruct((R, K), jnp.float32),        # one-hot y
            jax.ShapeDtypeStruct((K, 1), jnp.float32),        # sum(reduced_x, C)
            jax.ShapeDtypeStruct((K, 1), jnp.float32),        # sum(x, [R, C])
        ),
        grid_spec=pltpu.PrefetchScalarGridSpec(
            num_scalar_prefetch=0,
            grid=grid,
            in_specs=[
                pl.BlockSpec((tr, K), lambda i: (i, 0)),      # logits tile
                pl.BlockSpec((tr, C), lambda i: (i, 0)),      # D tile (bf16)
            ],
            out_specs=(
                pl.BlockSpec((tr, K), lambda i: (i, 0)),      # y tile
                pl.BlockSpec((K, 1), lambda i: (0, 0)),       # s1
                pl.BlockSpec((K, 1), lambda i: (0, 0)),       # s2
            ),
            scratch_shapes=[
                pltpu.VMEM((K, C), jnp.float32),              # lane-dense count acc
            ],
        ),
        compiler_params=pltpu.CompilerParams(
            dimension_semantics=("arbitrary",),               # reduction-carried
            vmem_limit_bytes=32 * 1024 * 1024),
        # TODO(synk): on v7x, split R across the 2 TensorCores with per-core
        # partial count accumulators plus a tiny combine for up to ~2x more.
    )(logits.astype(jnp.float32),
      D.astype(jnp.bfloat16))   # 0/1 -> exact in bf16; halves HBM bytes and is
                                # MXU-native on all gens (v7x has no int MXU).

    return y, s1[:, 0], s2[:, 0], logits


def reference_forward(logits, D):
    """Pure-JAX reference of the torch forward pass (for correctness check)."""
    soft = jax.nn.softmax(logits, axis=-1)
    idx = jnp.argmax(soft, axis=-1)
    y = jax.nn.one_hot(idx, logits.shape[-1], dtype=jnp.float32)
    x = y[:, None, :] * D[:, :, None]
    reduced_x = 1.0 - jnp.prod(1.0 - x, axis=0)
    return y, jnp.sum(reduced_x, axis=0), jnp.sum(x, axis=(0, 1))


if __name__ == "__main__":
    key = jax.random.PRNGKey(0)
    k_fc, k_y, k_g = jax.random.split(key, 3)

    # small shapes consistent with the module (original: R=2048, C=1000, K=32)
    # R deliberately NOT a multiple of the 256-row tile to exercise tail masking.
    R, C, K = 600, 256, 32
    sparsity = 0.9

    # prune_layer(fc, sparsity): binary mask of entries above the sparsity quantile
    fc = jax.random.normal(k_fc, (R, C), dtype=jnp.float32)
    flat = jnp.sort(jnp.abs(fc).reshape(-1))
    threshold = flat[int(R * C * sparsity) - 1]
    D = (jnp.abs(fc) > threshold).astype(jnp.float32)

    # nn.Parameter Y with torch.nn.init.kaiming_uniform_ (bound = sqrt(6 / fan_in))
    bound = float(np.sqrt(6.0 / K))
    Y = jax.random.uniform(k_y, (R, K), minval=-bound, maxval=bound,
                           dtype=jnp.float32)

    y, s1, s2, logits = clustering_forward(Y, D, key=k_g, training=True)
    jax.block_until_ready((y, s1, s2))

    # correctness check against a pure-JAX reference using the same noisy logits
    y_ref, s1_ref, s2_ref = reference_forward(logits, D)
    np.testing.assert_allclose(np.asarray(y), np.asarray(y_ref), atol=1e-6)
    np.testing.assert_allclose(np.asarray(s1), np.asarray(s1_ref), rtol=1e-5,
                               atol=1e-5)
    np.testing.assert_allclose(np.asarray(s2), np.asarray(s2_ref), rtol=1e-5,
                               atol=1e-5)

    print("KERNEL_OK")
</pallas_src>

<mosaic_0001>
module attributes {stable_mosaic.version = 11 : i64} {
  func.func @clustering_kernel(%arg0: i32, %arg1: memref<256x32xf32, #tpu.memory_space<vmem>>, %arg2: memref<256x256xbf16, #tpu.memory_space<vmem>>, %arg3: memref<256x32xf32, #tpu.memory_space<vmem>>, %arg4: memref<32x1xf32, #tpu.memory_space<vmem>>, %arg5: memref<32x1xf32, #tpu.memory_space<vmem>>, %arg6: memref<32x256xf32, #tpu.memory_space<vmem>>) attributes {dimension_semantics = [#tpu.dimension_semantics<arbitrary>], iteration_bounds = array<i64: 3>, scalar_prefetch = 0 : i64, scratch_operands = 1 : i64, tpu.core_type = #tpu.core_type<tc>, window_params = [{transform_indices = @transform_0, window_bounds = array<i64: 256, 32>}, {transform_indices = @transform_1, window_bounds = array<i64: 256, 256>}, {transform_indices = @transform_2, window_bounds = array<i64: 256, 32>}, {pipeline_mode = #tpu.pipeline_mode<synchronous>, transform_indices = @transform_3, window_bounds = array<i64: 32, 1>}, {pipeline_mode = #tpu.pipeline_mode<synchronous>, transform_indices = @transform_4, window_bounds = array<i64: 32, 1>}]} {
    %c0_i32 = arith.constant 0 : i32
    %0 = arith.cmpi eq, %arg0, %c0_i32 : i32
    %1 = arith.extui %0 : i1 to i32
    %c0_i32_0 = arith.constant 0 : i32
    %2 = arith.cmpi ne, %1, %c0_i32_0 : i32
    scf.if %2 {
      %cst_15 = arith.constant 0.000000e+00 : f32
      %41 = vector.broadcast %cst_15 : f32 to vector<32x256xf32>
      %c0_16 = arith.constant 0 : index
      %c0_17 = arith.constant 0 : index
      %42 = vector.load %arg6[%c0_16, %c0_17] : memref<32x256xf32, #tpu.memory_space<vmem>>, vector<32x256xf32>
      tpu.vector_store %arg6[%c0_16, %c0_17], %41 {strides = array<i32>} : memref<32x256xf32, #tpu.memory_space<vmem>>, vector<32x256xf32>,
    } else {
    }
    %c0 = arith.constant 0 : index
    %c0_1 = arith.constant 0 : index
    %3 = vector.load %arg1[%c0, %c0_1] : memref<256x32xf32, #tpu.memory_space<vmem>>, vector<256x32xf32>
    %4 = tpu.iota {dimensions = array<i32: 1>} : vector<256x32xi32>
    %cst = arith.constant dense<0xFF800000> : vector<256xf32>
    %5 = vector.multi_reduction <maximumf>, %3, %cst [1] : vector<256x32xf32> to vector<256xf32>
    %6 = vector.shape_cast %5 : vector<256xf32> to vector<256x1xf32>
    %7 = vector.broadcast %6 : vector<256x1xf32> to vector<256x32xf32>
    %8 = arith.cmpf oeq, %3, %7 : vector<256x32xf32>
    %c32_i32 = arith.constant 32 : i32
    %9 = vector.broadcast %c32_i32 : i32 to vector<256x32xi32>
    %10 = arith.select %8, %4, %9 : vector<256x32xi1>, vector<256x32xi32>
    %cst_2 = arith.constant dense<2147483647> : vector<256xi32>
    %11 = vector.multi_reduction <minsi>, %10, %cst_2 [1] : vector<256x32xi32> to vector<256xi32>
    %12 = vector.shape_cast %11 : vector<256xi32> to vector<256x1xi32>
    %13 = vector.broadcast %12 : vector<256x1xi32> to vector<256x32xi32>
    %14 = arith.cmpi eq, %4, %13 : vector<256x32xi32>
    %15 = arith.extui %14 : vector<256x32xi1> to vector<256x32xi32>
    %16 = arith.sitofp %15 : vector<256x32xi32> to vector<256x32xf32>
    %17 = tpu.iota {dimensions = array<i32: 0>} : vector<256x1xi32>
    %c256_i32 = arith.constant 256 : i32
    %18 = arith.muli %arg0, %c256_i32 : i32
    %19 = vector.broadcast %18 : i32 to vector<256x1xi32>
    %20 = arith.addi %17, %19 : vector<256x1xi32>
    %c600_i32 = arith.constant 600 : i32
    %21 = vector.broadcast %c600_i32 : i32 to vector<256x1xi32>
    %22 = arith.cmpi slt, %20, %21 : vector<256x1xi32>
    %cst_3 = arith.constant 0.000000e+00 : f32
    %23 = vector.shape_cast %22 : vector<256x1xi1> to vector<256x1xi1>
    %24 = vector.broadcast %23 : vector<256x1xi1> to vector<256x32xi1>
    %25 = vector.broadcast %cst_3 : f32 to vector<256x32xf32>
    %26 = arith.select %24, %16, %25 : vector<256x32xi1>, vector<256x32xf32>
    %c0_4 = arith.constant 0 : index
    %c0_5 = arith.constant 0 : index
    %27 = vector.load %arg3[%c0_4, %c0_5] : memref<256x32xf32, #tpu.memory_space<vmem>>, vector<256x32xf32>
    tpu.vector_store %arg3[%c0_4, %c0_5], %26 {strides = array<i32>} : memref<256x32xf32, #tpu.memory_space<vmem>>, vector<256x32xf32>,
    %c0_6 = arith.constant 0 : index
    %c0_7 = arith.constant 0 : index
    %28 = vector.load %arg2[%c0_6, %c0_7] : memref<256x256xbf16, #tpu.memory_space<vmem>>, vector<256x256xbf16>
    %cst_8 = arith.constant 0.000000e+00 : bf16
    %29 = vector.broadcast %cst_8 : bf16 to vector<256x256xbf16>
    %30 = vector.shape_cast %22 : vector<256x1xi1> to vector<256x1xi1>
    %31 = vector.broadcast %30 : vector<256x1xi1> to vector<256x256xi1>
    %32 = arith.select %31, %28, %29 : vector<256x256xi1>, vector<256x256xbf16>
    %c0_9 = arith.constant 0 : index
    %c0_10 = arith.constant 0 : index
    %33 = vector.load %arg6[%c0_9, %c0_10] : memref<32x256xf32, #tpu.memory_space<vmem>>, vector<32x256xf32>
    %34 = arith.truncf %26 : vector<256x32xf32> to vector<256x32xbf16>
    %cst_11 = arith.constant dense<0.000000e+00> : vector<32x256xf32>
    %35 = tpu.matmul %34, %32, %cst_11 {dimension_numbers = #tpu.dot_dimension_numbers<[0], [0], [1], [1], [0, 1, 1, 1], [], []>} : vector<256x32xbf16>, vector<256x256xbf16>, vector<32x256xf32> -> vector<32x256xf32>
    %36 = arith.addf %33, %35 : vector<32x256xf32>
    %c0_12 = arith.constant 0 : index
    %c0_13 = arith.constant 0 : index
    %37 = vector.load %arg6[%c0_12, %c0_13] : memref<32x256xf32, #tpu.memory_space<vmem>>, vector<32x256xf32>
    tpu.vector_store %arg6[%c0_12, %c0_13], %36 {strides = array<i32>} : memref<32x256xf32, #tpu.memory_space<vmem>>, vector<32x256xf32>,
    %c2_i32 = arith.constant 2 : i32
    %38 = arith.cmpi eq, %arg0, %c2_i32 : i32
    %39 = arith.extui %38 : i1 to i32
    %c0_i32_14 = arith.constant 0 : i32
    %40 = arith.cmpi ne, %39, %c0_i32_14 : i32
    scf.if %40 {
      %c0_15 = arith.constant 0 : index
      %c0_16 = arith.constant 0 : index
      %41 = vector.load %arg6[%c0_15, %c0_16] : memref<32x256xf32, #tpu.memory_space<vmem>>, vector<32x256xf32>
      %cst_17 = arith.constant 0.000000e+00 : f32
      %42 = vector.broadcast %cst_17 : f32 to vector<32x256xf32>
      %43 = arith.cmpf ogt, %41, %42 : vector<32x256xf32>
      %44 = arith.extui %43 : vector<32x256xi1> to vector<32x256xi32>
      %45 = arith.sitofp %44 : vector<32x256xi32> to vector<32x256xf32>
      %cst_18 = arith.constant dense<0.000000e+00> : vector<32xf32>
      %46 = vector.multi_reduction <add>, %45, %cst_18 [1] : vector<32x256xf32> to vector<32xf32>
      %47 = vector.shape_cast %46 : vector<32xf32> to vector<32x1xf32>
      %c0_19 = arith.constant 0 : index
      %c0_20 = arith.constant 0 : index
      %48 = vector.load %arg4[%c0_19, %c0_20] : memref<32x1xf32, #tpu.memory_space<vmem>>, vector<32x1xf32>
      tpu.vector_store %arg4[%c0_19, %c0_20], %47 {strides = array<i32>} : memref<32x1xf32, #tpu.memory_space<vmem>>, vector<32x1xf32>,
      %cst_21 = arith.constant dense<0.000000e+00> : vector<32xf32>
      %49 = vector.multi_reduction <add>, %41, %cst_21 [1] : vector<32x256xf32> to vector<32xf32>
      %50 = vector.shape_cast %49 : vector<32xf32> to vector<32x1xf32>
      %c0_22 = arith.constant 0 : index
      %c0_23 = arith.constant 0 : index
      %51 = vector.load %arg5[%c0_22, %c0_23] : memref<32x1xf32, #tpu.memory_space<vmem>>, vector<32x1xf32>
      tpu.vector_store %arg5[%c0_22, %c0_23], %50 {strides = array<i32>} : memref<32x1xf32, #tpu.memory_space<vmem>>, vector<32x1xf32>,
    } else {
    }
    return
  }
  func.func @transform_0(%arg0: i32) -> (i32, i32) {
    %c0_i32 = arith.constant 0 : i32
    %c0_i32_0 = arith.constant 0 : i32
    return %arg0, %c0_i32 : i32, i32
  }
  func.func @transform_1(%arg0: i32) -> (i32, i32) {
    %c0_i32 = arith.constant 0 : i32
    %c0_i32_0 = arith.constant 0 : i32
    return %arg0, %c0_i32 : i32, i32
  }
  func.func @transform_2(%arg0: i32) -> (i32, i32) {
    %c0_i32 = arith.constant 0 : i32
    %c0_i32_0 = arith.constant 0 : i32
    return %arg0, %c0_i32 : i32, i32
  }
  func.func @transform_3(%arg0: i32) -> (i32, i32) {
    %c0_i32 = arith.constant 0 : i32
    %c0_i32_0 = arith.constant 0 : i32
    %c0_i32_1 = arith.constant 0 : i32
    return %c0_i32, %c0_i32_0 : i32, i32
  }
  func.func @transform_4(%arg0: i32) -> (i32, i32) {
    %c0_i32 = arith.constant 0 : i32
    %c0_i32_0 = arith.constant 0 : i32
    %c0_i32_1 = arith.constant 0 : i32
    return %c0_i32, %c0_i32_0 : i32, i32
  }
}

</mosaic_0001>

<bundles_post_ra>
// kernel: tpu_custom_call.1
= control target key start
LH: loop header
LB: loop body
LE: loop exit
PB: predicated region body
PF: predicated region fallthrough
CT: control target
= control target key end

     0   :  { %s2433_s15 = smov 0   ;;  %s2435_s16 = smov 0   ;;  %s3835_s0 = inlined_call_operand.vmem [shape: f32[600,32], index: 0, kind: input, shape index: {}]   ;;  %s3836_s1 = inlined_call_operand.vmem [shape: bf16[600,256], index: 1, kind: input, shape index: {}]   ;;  %s3837_s2 = inlined_call_operand.vmem [shape: f32[600,32], index: 2, kind: output, shape index: {0}]   ;;  %s3838_s3 = inlined_call_operand.vmem [shape: f32[32,1], index: 3, kind: output, shape index: {1}]   ;;  %s3839_s4 = inlined_call_operand.vmem [shape: f32[32,1], index: 4, kind: output, shape index: {2}]  }
   0x1   :  { %s2437_s17 = smov 0  }
   0x2 LB: > { %s2444_s18 = sadd.s32 4294967295, %s2371_s17   ;;  %s2446_s19 = sadd.s32 1, %s2371_s17   ;;  %s2371_s17 = sphi %s2437_s17, %s4013_s17   ;;  %s2367_s16 = sphi %s2435_s16, %s4012_s16   ;;  %s2363_s15 = sphi %s2433_s15, %s4011_s15  }
   0x3   : > { %s71_s20 = ssub.s32 %s2371_s17, %s2446_s19  ;;  %s74_s21 = sadd.s32 1, %s2367_s16 }
   0x4   : > { %p72_p0 = scmp.eq.s32.totalorder %s71_s20, 0  ;;  %p84_p1 = scmp.ne.s32.totalorder %s2367_s16, %s2363_s15 }
   0x5   : > { %p85_p2 = scmp.eq.s32.totalorder %s2444_s18, 2  ;;  %p2091_p3 = scmp.ge.s32.totalorder %s2371_s17, 1 }
   0x6   : > { %s2453_s22 = scalar_select %p72_p0, %s2367_s16, %s74_s21  }
   0x7   : > { %p2455_p4 = por %p85_p2, %p84_p1  ;;  %p188_p5 = scmp.lt.s32.totalorder %s2371_s17, 4 }
   0x9   : > { %p189_p6 = pnand %p2091_p3, %p188_p5 }
   0xb   : > { %192 = sbr.rel (%p189_p6) target bundleno = 1063 (0x427), region = 28 }
  0x12   : > { %s221_s24 = sand.u32 1, %s2363_s15   ;;  %s2460_s25 = sshll.u32 %s2444_s18, 5 }
  0x13   : > { %s2092_s26 = sshll.u32 %s221_s24, 8  ;;  %p233_p7 = scmp.lt.s32.totalorder %s2460_s25, 74 }
  0x14   : > { %s2474_s9 = scalar_lea.vmem [#allocation3], %s2092_s26   ;;  %p2098_p8 = scmp.ne.s32.totalorder %s2444_s18, 0 }
  0x15   : > { %s234_s27 = scalar_select %p233_p7, %s2460_s25, 74 }
  0x16   : > { %268 = sbr.rel (%p2098_p8) target bundleno = 29 (0x1d), region = 32  ;;  %v2405_v0 = vmov (!%p2098_p8), 0.0  }
  0x17   : > { %s2094_s28 = sshll.u32 %s234_s27, 3  ;;  %269 = vst [vmem:[#allocation2] sm:$0xff] (!%p2098_p8), %v2405_v0  ;;  %270 = vst [vmem:[#allocation2 + $0x8] sm:$0xff] (!%p2098_p8), %v2405_v0 }
  0x18   : > { %s2467_s5 = scalar_lea.vmem %s3835_s0, %s2094_s28  ;;  %s2472_s8 = scalar_lea.vmem %s3836_s1, %s2094_s28  ;;  %271 = vst [vmem:[#allocation2 + $0x10] sm:$0xff] (!%p2098_p8), %v2405_v0  ;;  %272 = vst [vmem:[#allocation2 + $0x18] sm:$0xff] (!%p2098_p8), %v2405_v0 }
  0x19   : > { %273 = vst [vmem:[#allocation2 + $0x20] sm:$0xff] (!%p2098_p8), %v2405_v0  ;;  %274 = vst [vmem:[#allocation2 + $0x28] sm:$0xff] (!%p2098_p8), %v2405_v0 }
  0x1a   : > { %275 = vst [vmem:[#allocation2 + $0x30] sm:$0xff] (!%p2098_p8), %v2405_v0  ;;  %276 = vst [vmem:[#allocation2 + $0x38] sm:$0xff] (!%p2098_p8), %v2405_v0 }
  0x1d PF: > { %v2478_v1 = vld [vmem:[%s2467_s5 + $0x80] sm:$0xff]  ;;  %vm311_vm0 = vcmask 261120   ;;  %v2481_v2 = vld [vmem:[%s2467_s5 + $0x88] sm:$0xff]  ;;  %v2498_v9 = vld [vmem:[%s2467_s5 + $0x90] sm:$0xff]  ;;  %s2131_s10 = sshll.u32 %s2444_s18, 8  ;;  %p2164_p9 = scmp.ne.s32.totalorder %s2444_s18, 2 }
  0x1e   : > { %v2484_v3 = vld [vmem:[%s2467_s5] sm:$0xff]  ;;  %v360_v4 = vsel %vm311_vm0, %v2478_v1, -inf  ;;  %v2491_v6 = vld [vmem:[%s2467_s5 + $0x8] sm:$0xff]  ;;  %v363_v7 = vsel %vm311_vm0, %v2481_v2, -inf  ;;  %v2501_v10 = vld [vmem:[%s2467_s5 + $0x98] sm:$0xff]  ;;  %v366_v11 = vsel %vm311_vm0, %v2498_v9, -inf }
  0x1f   : > { %v312_v5 = vsel %vm311_vm0, %v2484_v3, -inf  ;;  %361 = vmax.xlane.f32.xlu0 %v360_v4  ;;  %v315_v8 = vsel %vm311_vm0, %v2491_v6, -inf  ;;  %v369_v12 = vsel %vm311_vm0, %v2501_v10, -inf  ;;  %v2508_v13 = vld [vmem:[%s2467_s5 + $0x10] sm:$0xff]  ;;  %v2511_v14 = vld [vmem:[%s2467_s5 + $0x18] sm:$0xff]  ;;  %v2518_v17 = vld [vmem:[%s2467_s5 + $0xa0] sm:$0xff]  ;;  %v3840_v4 = vlaneseq }
  0x20   : > { %313 = vmax.xlane.f32.xlu1 %v312_v5  ;;  %v318_v15 = vsel %vm311_vm0, %v2508_v13, -inf  ;;  %v321_v16 = vsel %vm311_vm0, %v2511_v14, -inf  ;;  %v2521_v18 = vld [vmem:[%s2467_s5 + $0xa8] sm:$0xff]  ;;  %v372_v19 = vsel %vm311_vm0, %v2518_v17, -inf  ;;  %v2528_v21 = vld [vmem:[%s2467_s5 + $0x20] sm:$0xff]  ;;  %v2538_v25 = vld [vmem:[%s2467_s5 + $0xb0] sm:$0xff] }
  0x21   : > { %v375_v20 = vsel %vm311_vm0, %v2521_v18, -inf  ;;  %v2531_v22 = vld [vmem:[%s2467_s5 + $0x28] sm:$0xff]  ;;  %v324_v23 = vsel %vm311_vm0, %v2528_v21, -inf  ;;  %v2541_v26 = vld [vmem:[%s2467_s5 + $0xb8] sm:$0xff]  ;;  %v378_v27 = vsel %vm311_vm0, %v2538_v25, -inf  ;;  %v2548_v29 = vld [vmem:[%s2467_s5 + $0x30] sm:$0xff] }
  0x22   : > { %v327_v24 = vsel %vm311_vm0, %v2531_v22, -inf  ;;  %v381_v28 = vsel %vm311_vm0, %v2541_v26, -inf  ;;  %v2551_v30 = vld [vmem:[%s2467_s5 + $0x38] sm:$0xff]  ;;  %v330_v31 = vsel %vm311_vm0, %v2548_v29, -inf  ;;  %v2558_v33 = vld [vmem:[%s2467_s5 + $0xc0] sm:$0xff]  ;;  %v2561_v34 = vld [vmem:[%s2467_s5 + $0xc8] sm:$0xff] }
  0x23   : > { %364 = vmax.xlane.f32.xlu0 %v363_v7  ;;  %v333_v32 = vsel %vm311_vm0, %v2551_v30, -inf  ;;  %v384_v35 = vsel %vm311_vm0, %v2558_v33, -inf  ;;  %v387_v36 = vsel %vm311_vm0, %v2561_v34, -inf  ;;  %v2568_v37 = vld [vmem:[%s2467_s5 + $0x40] sm:$0xff]  ;;  %v2571_v38 = vld [vmem:[%s2467_s5 + $0x48] sm:$0xff]  ;;  %v2578_v41 = vld [vmem:[%s2467_s5 + $0xd0] sm:$0xff] }
  0x24   : > { %316 = vmax.xlane.f32.xlu1 %v315_v8  ;;  %v336_v39 = vsel %vm311_vm0, %v2568_v37, -inf  ;;  %v339_v40 = vsel %vm311_vm0, %v2571_v38, -inf  ;;  %v2581_v42 = vld [vmem:[%s2467_s5 + $0xd8] sm:$0xff]  ;;  %v390_v43 = vsel %vm311_vm0, %v2578_v41, -inf  ;;  %v2588_v45 = vld [vmem:[%s2467_s5 + $0x50] sm:$0xff]  ;;  %v2598_v49 = vld [vmem:[%s2467_s5 + $0xe0] sm:$0xff] }
  0x25   : > { %v393_v44 = vsel %vm311_vm0, %v2581_v42, -inf  ;;  %v2591_v46 = vld [vmem:[%s2467_s5 + $0x58] sm:$0xff]  ;;  %v342_v47 = vsel %vm311_vm0, %v2588_v45, -inf  ;;  %v2601_v50 = vld [vmem:[%s2467_s5 + $0xe8] sm:$0xff]  ;;  %v396_v51 = vsel %vm311_vm0, %v2598_v49, -inf  ;;  %v2608_v53 = vld [vmem:[%s2467_s5 + $0x60] sm:$0xff] }
  0x26   : > { %v345_v48 = vsel %vm311_vm0, %v2591_v46, -inf  ;;  %v399_v52 = vsel %vm311_vm0, %v2601_v50, -inf  ;;  %v2611_v54 = vld [vmem:[%s2467_s5 + $0x68] sm:$0xff]  ;;  %v348_v55 = vsel %vm311_vm0, %v2608_v53, -inf  ;;  %v2618_v57 = vld [vmem:[%s2467_s5 + $0xf0] sm:$0xff]  ;;  %v2621_v58 = vld [vmem:[%s2467_s5 + $0xf8] sm:$0xff] }
  0x27   : > { %367 = vmax.xlane.f32.xlu0 %v366_v11  ;;  %v351_v56 = vsel %vm311_vm0, %v2611_v54, -inf  ;;  %v402_v59 = vsel %vm311_vm0, %v2618_v57, -inf  ;;  %v405_v60 = vsel %vm311_vm0, %v2621_v58, -inf  ;;  %v2628_v61 = vld [vmem:[%s2467_s5 + $0x70] sm:$0xff]  ;;  %v2631_v62 = vld [vmem:[%s2467_s5 + $0x78] sm:$0xff]  ;;  %v2638_v5 = vand.u32 127, %v3840_v4 }
  0x28   : > { %370 = vmax.xlane.f32.xlu1 %v369_v12  ;;  %v354_v63 = vsel %vm311_vm0, %v2628_v61, -inf  ;;  %v357_v0 = vsel %vm311_vm0, %v2631_v62, -inf }
  0x29   : > { %3898 = vst [vmem:[#allocation4_spill] sm:$0xff] %v2638_v5 }
  0x2b   : > { %319 = vmax.xlane.f32.xlu0 %v318_v15 }
  0x2c   : > { %322 = vmax.xlane.f32.xlu1 %v321_v16 }
  0x2f   : > { %373 = vmax.xlane.f32.xlu0 %v372_v19 }
  0x30   : > { %376 = vmax.xlane.f32.xlu1 %v375_v20 }
  0x33   : > { %325 = vmax.xlane.f32.xlu0 %v324_v23 }
  0x34   : > { %328 = vmax.xlane.f32.xlu1 %v327_v24 }
  0x37   : > { %379 = vmax.xlane.f32.xlu0 %v378_v27 }
  0x38   : > { %382 = vmax.xlane.f32.xlu1 %v381_v28 }
  0x3b   : > { %331 = vmax.xlane.f32.xlu0 %v330_v31 }
  0x3c   : > { %334 = vmax.xlane.f32.xlu1 %v333_v32 }
  0x3f   : > { %385 = vmax.xlane.f32.xlu0 %v384_v35 }
  0x40   : > { %388 = vmax.xlane.f32.xlu1 %v387_v36 }
  0x43   : > { %337 = vmax.xlane.f32.xlu0 %v336_v39 }
  0x44   : > { %340 = vmax.xlane.f32.xlu1 %v339_v40 }
  0x47   : > { %391 = vmax.xlane.f32.xlu0 %v390_v43 }
  0x48   : > { %394 = vmax.xlane.f32.xlu1 %v393_v44 }
  0x4b   : > { %343 = vmax.xlane.f32.xlu0 %v342_v47 }
  0x4c   : > { %346 = vmax.xlane.f32.xlu1 %v345_v48 }
  0x4f   : > { %397 = vmax.xlane.f32.xlu0 %v396_v51 }
  0x50   : > { %400 = vmax.xlane.f32.xlu1 %v399_v52 }
  0x53   : > { %349 = vmax.xlane.f32.xlu0 %v348_v55 }
  0x54   : > { %352 = vmax.xlane.f32.xlu1 %v351_v56 }
  0x57   : > { %403 = vmax.xlane.f32.xlu0 %v402_v59 }
  0x58   : > { %406 = vmax.xlane.f32.xlu1 %v405_v60 }
  0x5b   : > { %355 = vmax.xlane.f32.xlu0 %v354_v63 }
  0x5c   : > { %358 = vmax.xlane.f32.xlu1 %v357_v0 }
  0xac   : > { %v362_v7 = vpop.xlane.xlu0 %361 }
  0xad   : > { %v314_v8 = vpop.xlane.xlu1 %313  ;;  %vm424_vm1 = vcmp.eq.f32.partialorder %v2478_v1, %v362_v7 }
  0xae   : > { %vm408_vm2 = vcmp.eq.f32.partialorder %v2484_v3, %v314_v8  ;;  %v456_v11 = vsel %vm424_vm1, %v2638_v5, 32 }
  0xaf   : > { %v440_v12 = vsel %vm408_vm2, %v2638_v5, 32  ;;  %v2645_v15 = vsel %vm311_vm0, %v456_v11, 2147483647 }
  0xb0   : > { %v2648_v16 = vsel %vm311_vm0, %v440_v12, 2147483647  ;;  %v365_v19 = vpop.xlane.xlu0 %364  ;;  %v714_v20 = vshra.s32 %v2645_v15, 16 }
  0xb1   : > { %v317_v23 = vpop.xlane.xlu1 %316  ;;  %v474_v24 = vshra.s32 %v2648_v16, 16  ;;  %vm425_vm3 = vcmp.eq.f32.partialorder %v2481_v2, %v365_v19 }
  0xb2   : > { %vm409_vm4 = vcmp.eq.f32.partialorder %v2491_v6, %v317_v23  ;;  %v457_v1 = vsel %vm425_vm3, %v2638_v5, 32  ;;  %v2655_v3 = vcvt.s32.f32 %v714_v20 }
  0xb3   : > { %v441_v27 = vsel %vm409_vm4, %v2638_v5, 32  ;;  %v2659_v28 = vsel %vm311_vm0, %v457_v1, 2147483647  ;;  %v2666_v2 = vcvt.s32.f32 %v474_v24 }
  0xb4   : > { %v2662_v31 = vsel %vm311_vm0, %v441_v27, 2147483647  ;;  %v368_v32 = vpop.xlane.xlu0 %367  ;;  %717 = vmin.xlane.f32.xlu0 %v2655_v3  ;;  %v729_v35 = vshra.s32 %v2659_v28, 16 }
  0xb5   : > { %v371_v6 = vpop.xlane.xlu1 %370  ;;  %v489_v36 = vshra.s32 %v2662_v31, 16  ;;  %vm426_vm5 = vcmp.eq.f32.partialorder %v2498_v9, %v368_v32 }
  0xb6   : > { %vm427_vm6 = vcmp.eq.f32.partialorder %v2501_v10, %v371_v6  ;;  %v458_v39 = vsel %vm426_vm5, %v2638_v5, 32  ;;  %v2672_v40 = vcvt.s32.f32 %v729_v35 }
  0xb7   : > { %v459_v43 = vsel %vm427_vm6, %v2638_v5, 32  ;;  %v2676_v44 = vsel %vm311_vm0, %v458_v39, 2147483647  ;;  %v2684_v10 = vcvt.s32.f32 %v489_v36 }
  0xb8   : > { %v2679_v47 = vsel %vm311_vm0, %v459_v43, 2147483647  ;;  %v320_v48 = vpop.xlane.xlu0 %319  ;;  %732 = vmin.xlane.f32.xlu1 %v2672_v40  ;;  %477 = vmin.xlane.f32.xlu0 %v2666_v2  ;;  %v744_v9 = vshra.s32 %v2676_v44, 16 }
  0xb9   : > { %v323_v51 = vpop.xlane.xlu1 %322  ;;  %v759_v52 = vshra.s32 %v2679_v47, 16  ;;  %vm410_vm7 = vcmp.eq.f32.partialorder %v2508_v13, %v320_v48 }
  0xba   : > { %vm411_vm8 = vcmp.eq.f32.partialorder %v2511_v14, %v323_v51  ;;  %v442_v55 = vsel %vm410_vm7, %v2638_v5, 32  ;;  %v2690_v56 = vcvt.s32.f32 %v744_v9 }
  0xbb   : > { %v443_v59 = vsel %vm411_vm8, %v2638_v5, 32  ;;  %v2694_v60 = vsel %vm311_vm0, %v442_v55, 2147483647  ;;  %v2702_v14 = vcvt.s32.f32 %v759_v52 }
  0xbc   : > { %v2697_v63 = vsel %vm311_vm0, %v443_v59, 2147483647  ;;  %v374_v0 = vpop.xlane.xlu0 %373  ;;  %747 = vmin.xlane.f32.xlu0 %v2690_v56  ;;  %492 = vmin.xlane.f32.xlu1 %v2684_v10  ;;  %v504_v13 = vshra.s32 %v2694_v60, 16 }
  0xbd   : > { %v377_v7 = vpop.xlane.xlu1 %376  ;;  %v519_v8 = vshra.s32 %v2697_v63, 16  ;;  %vm428_vm9 = vcmp.eq.f32.partialorder %v2518_v17, %v374_v0 }
  0xbe   : > { %vm429_vm10 = vcmp.eq.f32.partialorder %v2521_v18, %v377_v7  ;;  %v460_v11 = vsel %vm428_vm9, %v2638_v5, 32  ;;  %v2708_v12 = vcvt.s32.f32 %v504_v13 }
  0xbf   : > { %v461_v19 = vsel %vm429_vm10, %v2638_v5, 32  ;;  %v2712_v20 = vsel %vm311_vm0, %v460_v11, 2147483647  ;;  %v2720_v18 = vcvt.s32.f32 %v519_v8 }
  0xc0   : > { %v2715_v23 = vsel %vm311_vm0, %v461_v19, 2147483647  ;;  %v326_v24 = vpop.xlane.xlu0 %325  ;;  %507 = vmin.xlane.f32.xlu0 %v2708_v12  ;;  %762 = vmin.xlane.f32.xlu1 %v2702_v14  ;;  %v774_v17 = vshra.s32 %v2712_v20, 16 }
  0xc1   : > { %v329_v1 = vpop.xlane.xlu1 %328  ;;  %v789_v27 = vshra.s32 %v2715_v23, 16  ;;  %vm412_vm11 = vcmp.eq.f32.partialorder %v2528_v21, %v326_v24 }
  0xc2   : > { %vm413_vm12 = vcmp.eq.f32.partialorder %v2531_v22, %v329_v1  ;;  %v444_v32 = vsel %vm412_vm11, %v2638_v5, 32  ;;  %v2726_v35 = vcvt.s32.f32 %v774_v17 }
  0xc3   : > { %v445_v6 = vsel %vm413_vm12, %v2638_v5, 32  ;;  %v2730_v36 = vsel %vm311_vm0, %v444_v32, 2147483647  ;;  %v2738_v22 = vcvt.s32.f32 %v789_v27 }
  0xc4   : > { %v2733_v39 = vsel %vm311_vm0, %v445_v6, 2147483647  ;;  %v380_v43 = vpop.xlane.xlu0 %379  ;;  %777 = vmin.xlane.f32.xlu0 %v2726_v35  ;;  %522 = vmin.xlane.f32.xlu1 %v2720_v18  ;;  %v534_v21 = vshra.s32 %v2730_v36, 16 }
  0xc5   : > { %v383_v48 = vpop.xlane.xlu1 %382  ;;  %v549_v9 = vshra.s32 %v2733_v39, 16  ;;  %vm430_vm13 = vcmp.eq.f32.partialorder %v2538_v25, %v380_v43 }
  0xc6   : > { %vm431_vm14 = vcmp.eq.f32.partialorder %v2541_v26, %v383_v48  ;;  %v462_v51 = vsel %vm430_vm13, %v2638_v5, 32  ;;  %v2744_v52 = vcvt.s32.f32 %v534_v21 }
  0xc7   : > { %v463_v55 = vsel %vm431_vm14, %v2638_v5, 32  ;;  %v2748_v59 = vsel %vm311_vm0, %v462_v51, 2147483647  ;;  %v2756_v26 = vcvt.s32.f32 %v549_v9 }
  0xc8   : > { %v2751_v0 = vsel %vm311_vm0, %v463_v55, 2147483647  ;;  %v332_v13 = vpop.xlane.xlu0 %331  ;;  %537 = vmin.xlane.f32.xlu0 %v2744_v52  ;;  %792 = vmin.xlane.f32.xlu1 %v2738_v22  ;;  %v804_v25 = vshra.s32 %v2748_v59, 16 }
  0xc9   : > { %v335_v7 = vpop.xlane.xlu1 %334  ;;  %v819_v8 = vshra.s32 %v2751_v0, 16  ;;  %vm414_vm15 = vcmp.eq.f32.partialorder %v2548_v29, %v332_v13 }
  0xca   : > { %vm415_vm1 = vcmp.eq.f32.partialorder %v2551_v30, %v335_v7  ;;  %v446_v11 = vsel %vm414_vm15, %v2638_v5, 32  ;;  %v2762_v19 = vcvt.s32.f32 %v804_v25 }
  0xcb   : > { %v447_v24 = vsel %vm415_vm1, %v2638_v5, 32  ;;  %v2766_v17 = vsel %vm311_vm0, %v446_v11, 2147483647  ;;  %v2774_v30 = vcvt.s32.f32 %v819_v8 }
  0xcc   : > { %v2769_v1 = vsel %vm311_vm0, %v447_v24, 2147483647  ;;  %v386_v27 = vpop.xlane.xlu0 %385  ;;  %807 = vmin.xlane.f32.xlu0 %v2762_v19  ;;  %552 = vmin.xlane.f32.xlu1 %v2756_v26  ;;  %v564_v29 = vshra.s32 %v2766_v17, 16 }
  0xcd   : > { %v389_v32 = vpop.xlane.xlu1 %388  ;;  %v579_v6 = vshra.s32 %v2769_v1, 16  ;;  %vm432_vm2 = vcmp.eq.f32.partialorder %v2558_v33, %v386_v27 }
  0xce   : > { %vm433_vm3 = vcmp.eq.f32.partialorder %v2561_v34, %v389_v32  ;;  %v464_v43 = vsel %vm432_vm2, %v2638_v5, 32  ;;  %v2780_v21 = vcvt.s32.f32 %v564_v29 }
  0xcf   : > { %v465_v48 = vsel %vm433_vm3, %v2638_v5, 32  ;;  %v2784_v9 = vsel %vm311_vm0, %v464_v43, 2147483647  ;;  %v2792_v34 = vcvt.s32.f32 %v579_v6 }
  0xd0   : > { %v2787_v51 = vsel %vm311_vm0, %v465_v48, 2147483647  ;;  %v338_v55 = vpop.xlane.xlu0 %337  ;;  %567 = vmin.xlane.f32.xlu0 %v2780_v21  ;;  %822 = vmin.xlane.f32.xlu1 %v2774_v30  ;;  %v834_v33 = vshra.s32 %v2784_v9, 16 }
  0xd1   : > { %v341_v13 = vpop.xlane.xlu1 %340  ;;  %v849_v25 = vshra.s32 %v2787_v51, 16  ;;  %vm416_vm4 = vcmp.eq.f32.partialorder %v2568_v37, %v338_v55 }
  0xd2   : > { %vm417_vm5 = vcmp.eq.f32.partialorder %v2571_v38, %v341_v13  ;;  %v448_v7 = vsel %vm416_vm4, %v2638_v5, 32  ;;  %v2798_v8 = vcvt.s32.f32 %v834_v33 }
  0xd3   : > { %v449_v11 = vsel %vm417_vm5, %v2638_v5, 32  ;;  %v2802_v24 = vsel %vm311_vm0, %v448_v7, 2147483647  ;;  %v2810_v38 = vcvt.s32.f32 %v849_v25 }
  0xd4   : > { %v2805_v27 = vsel %vm311_vm0, %v449_v11, 2147483647  ;;  %v392_v29 = vpop.xlane.xlu0 %391  ;;  %837 = vmin.xlane.f32.xlu0 %v2798_v8  ;;  %582 = vmin.xlane.f32.xlu1 %v2792_v34  ;;  %v594_v37 = vshra.s32 %v2802_v24, 16 }
  0xd5   : > { %v395_v32 = vpop.xlane.xlu1 %394  ;;  %v609_v6 = vshra.s32 %v2805_v27, 16  ;;  %vm434_vm6 = vcmp.eq.f32.partialorder %v2578_v41, %v392_v29 }
  0xd6   : > { %vm435_vm7 = vcmp.eq.f32.partialorder %v2581_v42, %v395_v32  ;;  %v466_v43 = vsel %vm434_vm6, %v2638_v5, 32  ;;  %v2816_v48 = vcvt.s32.f32 %v594_v37 }
  0xd7   : > { %v467_v55 = vsel %vm435_vm7, %v2638_v5, 32  ;;  %v2820_v33 = vsel %vm311_vm0, %v466_v43, 2147483647  ;;  %v2828_v42 = vcvt.s32.f32 %v609_v6 }
  0xd8   : > { %v2823_v13 = vsel %vm311_vm0, %v467_v55, 2147483647  ;;  %v344_v25 = vpop.xlane.xlu0 %343  ;;  %597 = vmin.xlane.f32.xlu0 %v2816_v48  ;;  %852 = vmin.xlane.f32.xlu1 %v2810_v38  ;;  %v864_v41 = vshra.s32 %v2820_v33, 16 }
  0xd9   : > { %3899 = vst [vmem:[#allocation5_spill] sm:$0xff] %v2828_v42  ;;  %v347_v7 = vpop.xlane.xlu1 %346  ;;  %v879_v11 = vshra.s32 %v2823_v13, 16  ;;  %vm418_vm8 = vcmp.eq.f32.partialorder %v2588_v45, %v344_v25 }
  0xda   : > { %vm419_vm9 = vcmp.eq.f32.partialorder %v2591_v46, %v347_v7  ;;  %v450_v29 = vsel %vm418_vm8, %v2638_v5, 32  ;;  %v2834_v37 = vcvt.s32.f32 %v864_v41 }
  0xdb   : > { %v451_v32 = vsel %vm419_vm9, %v2638_v5, 32  ;;  %v2838_v43 = vsel %vm311_vm0, %v450_v29, 2147483647  ;;  %v2846_v46 = vcvt.s32.f32 %v879_v11 }
  0xdc   : > { %v2841_v55 = vsel %vm311_vm0, %v451_v32, 2147483647  ;;  %v398_v6 = vpop.xlane.xlu0 %397  ;;  %867 = vmin.xlane.f32.xlu0 %v2834_v37  ;;  %612 = vmin.xlane.f32.xlu1 %v2828_v42  ;;  %v624_v45 = vshra.s32 %v2838_v43, 16 }
  0xdd   : > { %3900 = vst [vmem:[#allocation6_spill] sm:$0xff] %v2846_v46  ;;  %v401_v25 = vpop.xlane.xlu1 %400  ;;  %v639_v41 = vshra.s32 %v2841_v55, 16  ;;  %vm436_vm10 = vcmp.eq.f32.partialorder %v2598_v49, %v398_v6 }
  0xde   : > { %vm437_vm11 = vcmp.eq.f32.partialorder %v2601_v50, %v401_v25  ;;  %v468_v7 = vsel %vm436_vm10, %v2638_v5, 32  ;;  %v2852_v29 = vcvt.s32.f32 %v624_v45 }
  0xdf   : > { %v469_v32 = vsel %vm437_vm11, %v2638_v5, 32  ;;  %v2856_v4 = vsel %vm311_vm0, %v468_v7, 2147483647  ;;  %v2864_v50 = vcvt.s32.f32 %v639_v41 }
  0xe0   : > { %3901 = vst [vmem:[#allocation7_spill] sm:$0xff] %v2852_v29  ;;  %v2859_v42 = vsel %vm311_vm0, %v469_v32, 2147483647  ;;  %v350_v11 = vpop.xlane.xlu0 %349  ;;  %627 = vmin.xlane.f32.xlu0 %v2852_v29  ;;  %882 = vmin.xlane.f32.xlu1 %v2846_v46  ;;  %v894_v49 = vshra.s32 %v2856_v4, 16 }
  0xe1   : > { %3902 = vst [vmem:[#allocation8_spill] sm:$0xff] %v2864_v50  ;;  %v353_v6 = vpop.xlane.xlu1 %352  ;;  %v909_v45 = vshra.s32 %v2859_v42, 16  ;;  %vm420_vm12 = vcmp.eq.f32.partialorder %v2608_v53, %v350_v11 }
  0xe2   : > { %vm421_vm13 = vcmp.eq.f32.partialorder %v2611_v54, %v353_v6  ;;  %v452_v25 = vsel %vm420_vm12, %v2638_v5, 32  ;;  %v2870_v7 = vcvt.s32.f32 %v894_v49 }
  0xe3   : > { %v453_v32 = vsel %vm421_vm13, %v2638_v5, 32  ;;  %v2874_v29 = vsel %vm311_vm0, %v452_v25, 2147483647  ;;  %v2882_v54 = vcvt.s32.f32 %v909_v45 }
  0xe4   : > { %3903 = vst [vmem:[#allocation9_spill] sm:$0xff] %v2870_v7  ;;  %v2877_v46 = vsel %vm311_vm0, %v453_v32, 2147483647  ;;  %v404_v41 = vpop.xlane.xlu0 %403  ;;  %897 = vmin.xlane.f32.xlu0 %v2870_v7  ;;  %642 = vmin.xlane.f32.xlu1 %v2864_v50  ;;  %v654_v53 = vshra.s32 %v2874_v29, 16 }
  0xe5   : > { %3904 = vst [vmem:[#allocation10_spill] sm:$0xff] %v2882_v54  ;;  %v407_v11 = vpop.xlane.xlu1 %406  ;;  %v669_v49 = vshra.s32 %v2877_v46, 16  ;;  %vm438_vm14 = vcmp.eq.f32.partialorder %v2618_v57, %v404_v41 }
  0xe6   : > { %vm439_vm15 = vcmp.eq.f32.partialorder %v2621_v58, %v407_v11  ;;  %v470_v6 = vsel %vm438_vm14, %v2638_v5, 32  ;;  %v2888_v25 = vcvt.s32.f32 %v654_v53 }
  0xe7   : > { %v471_v32 = vsel %vm439_vm15, %v2638_v5, 32  ;;  %v2892_v7 = vsel %vm311_vm0, %v470_v6, 2147483647  ;;  %v2900_v58 = vcvt.s32.f32 %v669_v49 }
  0xe8   : > { %3905 = vst [vmem:[#allocation11_spill] sm:$0xff] %v2888_v25  ;;  %v2895_v50 = vsel %vm311_vm0, %v471_v32, 2147483647  ;;  %v356_v45 = vpop.xlane.xlu0 %355  ;;  %657 = vmin.xlane.f32.xlu0 %v2888_v25  ;;  %912 = vmin.xlane.f32.xlu1 %v2882_v54  ;;  %v924_v57 = vshra.s32 %v2892_v7, 16 }
  0xe9   : > { %v359_v41 = vpop.xlane.xlu1 %358  ;;  %v939_v53 = vshra.s32 %v2895_v50, 16  ;;  %vm422_vm1 = vcmp.eq.f32.partialorder %v2628_v61, %v356_v45 }
  0xea   : > { %vm423_vm2 = vcmp.eq.f32.partialorder %v2631_v62, %v359_v41  ;;  %v454_v11 = vsel %vm422_vm1, %v2638_v5, 32  ;;  %v2906_v6 = vcvt.s32.f32 %v924_v57  ;;  %v713_v41 = vand.u32 65535, %v2645_v15 }
  0xeb   : > { %v455_v32 = vsel %vm423_vm2, %v2638_v5, 32  ;;  %v2910_v25 = vsel %vm311_vm0, %v454_v11, 2147483647  ;;  %v2918_v49 = vcvt.s32.f32 %v939_v53  ;;  %v473_v53 = vand.u32 65535, %v2648_v16 }
  0xec   : > { %v2913_v54 = vsel %vm311_vm0, %v455_v32, 2147483647  ;;  %927 = vmin.xlane.f32.xlu0 %v2906_v6  ;;  %672 = vmin.xlane.f32.xlu1 %v2900_v58  ;;  %v684_v61 = vshra.s32 %v2910_v25, 16  ;;  %v715_v32 = vcvt.s32.f32 %v713_v41  ;;  %v728_v5 = vand.u32 65535, %v2659_v28 }
  0xed   : > { %3906 = vst [vmem:[#allocation12_spill] sm:$0xff] %v2913_v54  ;;  %3907 = vst [vmem:[#allocation13_spill] sm:$0xff] %v2918_v49  ;;  %v699_v62 = vshra.s32 %v2913_v54, 16  ;;  %v743_v15 = vand.u32 65535, %v2676_v44  ;;  %v488_v54 = vand.u32 65535, %v2662_v31  ;;  %v503_v44 = vand.u32 65535, %v2694_v60 }
  0xee   : > { %v2921_v45 = vcvt.s32.f32 %v684_v61  ;;  %v758_v31 = vand.u32 65535, %v2679_v47  ;;  %v773_v60 = vand.u32 65535, %v2712_v20  ;;  %v518_v47 = vand.u32 65535, %v2697_v63 }
  0xef   : > { %v2925_v57 = vcvt.s32.f32 %v699_v62  ;;  %v533_v20 = vand.u32 65535, %v2730_v36  ;;  %v788_v63 = vand.u32 65535, %v2715_v23  ;;  %v803_v36 = vand.u32 65535, %v2748_v59 }
  0xf0   : > { %3908 = vst [vmem:[#allocation14_spill] sm:$0xff] %v2921_v45  ;;  %687 = vmin.xlane.f32.xlu0 %v2921_v45  ;;  %942 = vmin.xlane.f32.xlu1 %v2918_v49  ;;  %v475_v49 = vcvt.s32.f32 %v473_v53  ;;  %v505_v53 = vcvt.s32.f32 %v503_v44  ;;  %v548_v23 = vand.u32 65535, %v2733_v39  ;;  %v563_v59 = vand.u32 65535, %v2766_v17 }
  0xf1   : > { %3909 = vst [vmem:[#allocation15_spill] sm:$0xff] %v2925_v57  ;;  %v535_v44 = vcvt.s32.f32 %v533_v20  ;;  %v818_v39 = vand.u32 65535, %v2751_v0  ;;  %v833_v17 = vand.u32 65535, %v2784_v9  ;;  %v578_v0 = vand.u32 65535, %v2769_v1 }
  0xf2   : > { %v593_v9 = vand.u32 65535, %v2802_v24  ;;  %v848_v1 = vand.u32 65535, %v2787_v51  ;;  %v863_v24 = vand.u32 65535, %v2820_v33  ;;  %v608_v51 = vand.u32 65535, %v2805_v27 }
  0xf3   : > { %v835_v20 = vcvt.s32.f32 %v833_v17  ;;  %v623_v33 = vand.u32 65535, %v2838_v43  ;;  %v878_v27 = vand.u32 65535, %v2823_v13  ;;  %v893_v43 = vand.u32 65535, %v2856_v4 }
  0xf4   : > { %702 = vmin.xlane.f32.xlu1 %v2925_v57  ;;  %v730_v57 = vcvt.s32.f32 %v728_v5  ;;  %v490_v5 = vcvt.s32.f32 %v488_v54  ;;  %v760_v54 = vcvt.s32.f32 %v758_v31  ;;  %v790_v31 = vcvt.s32.f32 %v788_v63 }
  0xf5   : > { %v580_v63 = vcvt.s32.f32 %v578_v0  ;;  %v638_v13 = vand.u32 65535, %v2841_v55  ;;  %v653_v4 = vand.u32 65535, %v2874_v29  ;;  %v908_v55 = vand.u32 65535, %v2859_v42 }
  0xf6   : > { %v923_v29 = vand.u32 65535, %v2892_v7  ;;  %v668_v42 = vand.u32 65535, %v2877_v46  ;;  %v683_v7 = vand.u32 65535, %v2910_v25  ;;  %v938_v46 = vand.u32 65535, %v2895_v50  ;;  %v3924_v25 = vld [vmem:[#allocation12_spill] sm:$0xff] }
  0xf7   : > { %v3925_v50 = vld [vmem:[#allocation14_spill] sm:$0xff] }
 0x141   : > { %v2929_v11 = vpop.xlane.xlu0 %717 }
 0x142   : > { %vm719_vm3 = vcmp.eq.f32.partialorder %v2655_v3, %v2929_v11 }
 0x143   : > { %v720_v61 = vsel %vm719_vm3, %v715_v32, inf  ;;  %v745_v32 = vcvt.s32.f32 %v743_v15 }
 0x144   : > { %721 = vmin.xlane.f32.xlu0 %v720_v61 }
 0x145   : > { %v2935_v45 = vpop.xlane.xlu0 %477  ;;  %v2937_v62 = vpop.xlane.xlu1 %732 }
 0x146   : > { %vm479_vm4 = vcmp.eq.f32.partialorder %v2666_v2, %v2935_v45  ;;  %vm734_vm5 = vcmp.eq.f32.partialorder %v2672_v40, %v2937_v62 }
 0x147   : > { %v480_v16 = vsel %vm479_vm4, %v475_v49, inf  ;;  %v735_v3 = vsel %vm734_vm5, %v730_v57, inf }
 0x148   : > { %481 = vmin.xlane.f32.xlu0 %v480_v16  ;;  %736 = vmin.xlane.f32.xlu1 %v735_v3  ;;  %v775_v16 = vcvt.s32.f32 %v773_v60  ;;  %v520_v3 = vcvt.s32.f32 %v518_v47 }
 0x149   : > { %v2945_v28 = vpop.xlane.xlu0 %747  ;;  %v2947_v41 = vpop.xlane.xlu1 %492 }
 0x14a   : > { %vm749_vm6 = vcmp.eq.f32.partialorder %v2690_v56, %v2945_v28  ;;  %vm494_vm7 = vcmp.eq.f32.partialorder %v2684_v10, %v2947_v41 }
 0x14b   : > { %v750_v2 = vsel %vm749_vm6, %v745_v32, inf  ;;  %v495_v40 = vsel %vm494_vm7, %v490_v5, inf }
 0x14c   : > { %751 = vmin.xlane.f32.xlu0 %v750_v2  ;;  %496 = vmin.xlane.f32.xlu1 %v495_v40 }
 0x14d   : > { %v2955_v49 = vpop.xlane.xlu0 %507  ;;  %v2957_v57 = vpop.xlane.xlu1 %762 }
 0x14e   : > { %vm509_vm8 = vcmp.eq.f32.partialorder %v2708_v12, %v2955_v49  ;;  %vm764_vm9 = vcmp.eq.f32.partialorder %v2702_v14, %v2957_v57 }
 0x14f   : > { %v510_v10 = vsel %vm509_vm8, %v505_v53, inf  ;;  %v765_v56 = vsel %vm764_vm9, %v760_v54, inf  ;;  %v805_v53 = vcvt.s32.f32 %v803_v36  ;;  %v550_v54 = vcvt.s32.f32 %v548_v23 }
 0x150   : > { %511 = vmin.xlane.f32.xlu0 %v510_v10  ;;  %766 = vmin.xlane.f32.xlu1 %v765_v56  ;;  %v565_v10 = vcvt.s32.f32 %v563_v59  ;;  %v820_v56 = vcvt.s32.f32 %v818_v39  ;;  %v625_v39 = vcvt.s32.f32 %v623_v33  ;;  %v925_v33 = vcvt.s32.f32 %v923_v29 }
 0x151   : > { %v2965_v61 = vpop.xlane.xlu0 %777  ;;  %v2967_v15 = vpop.xlane.xlu1 %522 }
 0x152   : > { %vm779_vm10 = vcmp.eq.f32.partialorder %v2726_v35, %v2965_v61  ;;  %vm524_vm11 = vcmp.eq.f32.partialorder %v2720_v18, %v2967_v15 }
 0x153   : > { %v780_v14 = vsel %vm779_vm10, %v775_v16, inf  ;;  %v525_v12 = vsel %vm524_vm11, %v520_v3, inf }
 0x154   : > { %781 = vmin.xlane.f32.xlu0 %v780_v14  ;;  %526 = vmin.xlane.f32.xlu1 %v525_v12 }
 0x155   : > { %v2975_v32 = vpop.xlane.xlu0 %537  ;;  %v2977_v5 = vpop.xlane.xlu1 %792 }
 0x156   : > { %vm539_vm12 = vcmp.eq.f32.partialorder %v2744_v52, %v2975_v32  ;;  %vm794_vm13 = vcmp.eq.f32.partialorder %v2738_v22, %v2977_v5 }
 0x157   : > { %v540_v18 = vsel %vm539_vm12, %v535_v44, inf  ;;  %v795_v35 = vsel %vm794_vm13, %v790_v31, inf  ;;  %v595_v44 = vcvt.s32.f32 %v593_v9  ;;  %v850_v31 = vcvt.s32.f32 %v848_v1 }
 0x158   : > { %541 = vmin.xlane.f32.xlu0 %v540_v18  ;;  %796 = vmin.xlane.f32.xlu1 %v795_v35  ;;  %v865_v18 = vcvt.s32.f32 %v863_v24  ;;  %v610_v35 = vcvt.s32.f32 %v608_v51  ;;  %v3918_v24 = vld [vmem:[#allocation11_spill] sm:$0xff]  ;;  %v3919_v51 = vld [vmem:[#allocation10_spill] sm:$0xff] }
 0x159   : > { %v2985_v2 = vpop.xlane.xlu0 %807  ;;  %v2987_v40 = vpop.xlane.xlu1 %552 }
 0x15a   : > { %vm809_vm14 = vcmp.eq.f32.partialorder %v2762_v19, %v2985_v2  ;;  %vm554_vm15 = vcmp.eq.f32.partialorder %v2756_v26, %v2987_v40 }
 0x15b   : > { %v810_v22 = vsel %vm809_vm14, %v805_v53, inf  ;;  %v555_v52 = vsel %vm554_vm15, %v550_v54, inf }
 0x15c   : > { %811 = vmin.xlane.f32.xlu0 %v810_v22  ;;  %556 = vmin.xlane.f32.xlu1 %v555_v52  ;;  %v880_v22 = vcvt.s32.f32 %v878_v27  ;;  %v3911_v52 = vld [vmem:[#allocation7_spill] sm:$0xff]  ;;  %v670_v27 = vcvt.s32.f32 %v668_v42 }
 0x15d   : > { %v2995_v60 = vpop.xlane.xlu0 %567  ;;  %v2997_v47 = vpop.xlane.xlu1 %822 }
 0x15e   : > { %vm569_vm1 = vcmp.eq.f32.partialorder %v2780_v21, %v2995_v60  ;;  %vm824_vm2 = vcmp.eq.f32.partialorder %v2774_v30, %v2997_v47 }
 0x15f   : > { %v570_v26 = vsel %vm569_vm1, %v565_v10, inf  ;;  %v825_v19 = vsel %vm824_vm2, %v820_v56, inf }
 0x160   : > { %571 = vmin.xlane.f32.xlu0 %v570_v26  ;;  %826 = vmin.xlane.f32.xlu1 %v825_v19  ;;  %v895_v26 = vcvt.s32.f32 %v893_v43  ;;  %v640_v19 = vcvt.s32.f32 %v638_v13  ;;  %v940_v43 = vcvt.s32.f32 %v938_v46  ;;  %v698_v13 = vand.u32 65535, %v3924_v25  ;;  %v1275_v46 = vld [vmem:[%s2472_s8] sm:$0xff]  ;;  %v1278_v25 = vld [vmem:[%s2472_s8 + $0x18] sm:$0xff] }
 0x161   : > { %v3005_v16 = vpop.xlane.xlu0 %837  ;;  %v3007_v3 = vpop.xlane.xlu1 %582 }
 0x162   : > { %vm839_vm3 = vcmp.eq.f32.partialorder %v2798_v8, %v3005_v16  ;;  %vm584_vm4 = vcmp.eq.f32.partialorder %v2792_v34, %v3007_v3 }
 0x163   : > { %v840_v30 = vsel %vm839_vm3, %v835_v20, inf  ;;  %v585_v21 = vsel %vm584_vm4, %v580_v63, inf  ;;  %v3914_v20 = vld [vmem:[#allocation9_spill] sm:$0xff]  ;;  %v3915_v63 = vld [vmem:[#allocation8_spill] sm:$0xff] }
 0x164   : > { %841 = vmin.xlane.f32.xlu0 %v840_v30  ;;  %586 = vmin.xlane.f32.xlu1 %v585_v21 }
 0x165   : > { %v3015_v14 = vpop.xlane.xlu0 %597  ;;  %v3017_v12 = vpop.xlane.xlu1 %852 }
 0x166   : > { %vm599_vm5 = vcmp.eq.f32.partialorder %v2816_v48, %v3015_v14  ;;  %vm854_vm6 = vcmp.eq.f32.partialorder %v2810_v38, %v3017_v12  ;;  %v3910_v48 = vld [vmem:[#allocation5_spill] sm:$0xff] }
 0x167   : > { %v600_v34 = vsel %vm599_vm5, %v595_v44, inf  ;;  %v855_v8 = vsel %vm854_vm6, %v850_v31, inf  ;;  %v655_v44 = vcvt.s32.f32 %v653_v4  ;;  %v910_v31 = vcvt.s32.f32 %v908_v55 }
 0x168   : > { %601 = vmin.xlane.f32.xlu0 %v600_v34  ;;  %856 = vmin.xlane.f32.xlu1 %v855_v8 }
 0x169   : > { %v3025_v36 = vpop.xlane.xlu0 %867  ;;  %v3027_v23 = vpop.xlane.xlu1 %612 }
 0x16a   : > { %vm869_vm7 = vcmp.eq.f32.partialorder %v2834_v37, %v3025_v36  ;;  %vm614_vm8 = vcmp.eq.f32.partialorder %v3910_v48, %v3027_v23  ;;  %v3912_v37 = vld [vmem:[#allocation6_spill] sm:$0xff] }
 0x16b   : > { %v870_v38 = vsel %vm869_vm7, %v865_v18, inf  ;;  %v615_v53 = vsel %vm614_vm8, %v610_v35, inf }
 0x16c   : > { %871 = vmin.xlane.f32.xlu0 %v870_v38  ;;  %616 = vmin.xlane.f32.xlu1 %v615_v53 }
 0x16d   : > { %v3035_v54 = vpop.xlane.xlu0 %627  ;;  %v3037_v59 = vpop.xlane.xlu1 %882 }
 0x16e   : > { %vm629_vm9 = vcmp.eq.f32.partialorder %v3911_v52, %v3035_v54  ;;  %vm884_vm10 = vcmp.eq.f32.partialorder %v3912_v37, %v3037_v59 }
 0x16f   : > { %v630_v10 = vsel %vm629_vm9, %v625_v39, inf  ;;  %v885_v56 = vsel %vm884_vm10, %v880_v22, inf  ;;  %v685_v22 = vcvt.s32.f32 %v683_v7 }
 0x170   : > { %631 = vmin.xlane.f32.xlu0 %v630_v10  ;;  %886 = vmin.xlane.f32.xlu1 %v885_v56  ;;  %v700_v10 = vcvt.s32.f32 %v698_v13  ;;  %v3928_v56 = vld [vmem:[#allocation15_spill] sm:$0xff] }
 0x171   : > { %v3045_v17 = vpop.xlane.xlu0 %897  ;;  %v3047_v0 = vpop.xlane.xlu1 %642 }
 0x172   : > { %3913 = vst [vmem:[#allocation5_spill] sm:$0xff] %v3047_v0  ;;  %vm899_vm11 = vcmp.eq.f32.partialorder %v3914_v20, %v3045_v17  ;;  %vm644_vm12 = vcmp.eq.f32.partialorder %v3915_v63, %v3047_v0 }
 0x173   : > { %v900_v9 = vsel %vm899_vm11, %v895_v26, inf  ;;  %v645_v1 = vsel %vm644_vm12, %v640_v19, inf  ;;  %v3929_v19 = vlaneseq }
 0x174   : > { %901 = vmin.xlane.f32.xlu0 %v900_v9  ;;  %646 = vmin.xlane.f32.xlu1 %v645_v1  ;;  %v3098_v1 = vstv %s2131_s10 }
 0x175   : > { %v3055_v30 = vpop.xlane.xlu0 %657  ;;  %v3057_v21 = vpop.xlane.xlu1 %912  ;;  %v3089_v4 = vshrl.u32 %v3929_v19, 7 }
 0x176   : > { %3916 = vst [vmem:[#allocation7_spill] sm:$0xff] %v3055_v30  ;;  %3917 = vst [vmem:[#allocation6_spill] sm:$0xff] %v3057_v21  ;;  %vm659_vm13 = vcmp.eq.f32.partialorder %v3918_v24, %v3055_v30  ;;  %vm914_vm14 = vcmp.eq.f32.partialorder %v3919_v51, %v3057_v21 }
 0x177   : > { %v660_v34 = vsel %vm659_vm13, %v655_v44, inf  ;;  %v915_v8 = vsel %vm914_vm14, %v910_v31, inf  ;;  %v1050_v55 = vadd.s32 8, %v3089_v4  ;;  %v1051_v20 = vadd.s32 16, %v3089_v4 }
 0x178   : > { %661 = vmin.xlane.f32.xlu0 %v660_v34  ;;  %916 = vmin.xlane.f32.xlu1 %v915_v8  ;;  %v1052_v63 = vadd.s32 24, %v3089_v4  ;;  %v1053_v9 = vadd.s32 32, %v3089_v4  ;;  %v3102_v44 = vadd.s32 %v3098_v1, %v3089_v4  ;;  %v1054_v42 = vadd.s32 40, %v3089_v4 }
 0x179   : > { %v3065_v18 = vpop.xlane.xlu0 %927  ;;  %v3067_v35 = vpop.xlane.xlu1 %672  ;;  %v3105_v31 = vadd.s32 %v3098_v1, %v1050_v55  ;;  %v3108_v29 = vadd.s32 %v3098_v1, %v1051_v20  ;;  %v1055_v34 = vadd.s32 48, %v3089_v4  ;;  %v1056_v8 = vadd.s32 56, %v3089_v4  ;;  %v1280_v55 = vld [vmem:[%s2472_s8 + $0x28] sm:$0xff] }
 0x17a   : > { %3920 = vst [vmem:[#allocation9_spill] sm:$0xff] %v3065_v18  ;;  %3921 = vst [vmem:[#allocation8_spill] sm:$0xff] %v3067_v35  ;;  %vm929_vm15 = vcmp.eq.f32.partialorder %v2906_v6, %v3065_v18  ;;  %vm674_vm1 = vcmp.eq.f32.partialorder %v2900_v58, %v3067_v35  ;;  %v3926_v6 = vld [vmem:[#allocation13_spill] sm:$0xff]  ;;  %v3112_v24 = vadd.s32 %v3098_v1, %v1052_v63  ;;  %vm1115_vm5 = vcmp.lt.s32.totalorder %v3102_v44, 600 }
 0x17b   : > { %v930_v48 = vsel %vm929_vm15, %v925_v33, inf  ;;  %v675_v38 = vsel %vm674_vm1, %v670_v27, inf  ;;  %v3115_v51 = vadd.s32 %v3098_v1, %v1053_v9  ;;  %v1057_v33 = vadd.s32 64, %v3089_v4  ;;  %vm1307_vm8 = vmpackc.low %vm1115_vm5, %vm1115_vm5 }
 0x17c   : > { %931 = vmin.xlane.f32.xlu0 %v930_v48  ;;  %676 = vmin.xlane.f32.xlu1 %v675_v38  ;;  %vm1116_vm6 = vcmp.lt.s32.totalorder %v3105_v31, 600  ;;  %vm1117_vm7 = vcmp.lt.s32.totalorder %v3108_v29, 600  ;;  %v3124_v27 = vadd.s32 %v3098_v1, %v1054_v42  ;;  %v1058_v7 = vadd.s32 72, %v3089_v4  ;;  %v1276_v48 = vld [vmem:[%s2472_s8 + $0x8] sm:$0xff] }
 0x17d   : > { %v3075_v53 = vpop.xlane.xlu0 %687  ;;  %v3077_v39 = vpop.xlane.xlu1 %942  ;;  %vm1118_vm9 = vcmp.lt.s32.totalorder %v3112_v24, 600  ;;  %vm3877_vm10 = vcmp.lt.s32.totalorder %v3115_v51, 600  ;;  %v3135_v38 = vadd.s32 %v3098_v1, %v1055_v34  ;;  %vm1308_vm11 = vmpackc.low %vm1116_vm6, %vm1116_vm6  ;;  %v3143_v13 = vadd.s32 %v3098_v1, %v1056_v8  ;;  %v1281_v34 = vld [vmem:[%s2472_s8 + $0x30] sm:$0xff]  ;;  %v1282_v8 = vld [vmem:[%s2472_s8 + $0x38] sm:$0xff] }
 0x17e   : > { %3922 = vst [vmem:[#allocation11_spill] sm:$0xff] %v3075_v53  ;;  %3923 = vst [vmem:[#allocation10_spill] sm:$0xff] %v3077_v39  ;;  %vm689_vm2 = vcmp.eq.f32.partialorder %v3925_v50, %v3075_v53  ;;  %vm944_vm3 = vcmp.eq.f32.partialorder %v3926_v6, %v3077_v39  ;;  %v3146_v50 = vadd.s32 %v3098_v1, %v1057_v33  ;;  %v1059_v6 = vadd.s32 80, %v3089_v4 }
 0x17f   : > { %v690_v58 = vsel %vm689_vm2, %v685_v22, inf  ;;  %v945_v52 = vsel %vm944_vm3, %v940_v43, inf  ;;  %v1339_v22 = vsel %vm1307_vm8, %v1275_v46, 0  ;;  %v1277_v43 = vld [vmem:[%s2472_s8 + $0x10] sm:$0xff]  ;;  %vm1309_vm12 = vmpackc.low %vm1117_vm7, %vm1117_vm7  ;;  %vm3874_vm14 = vcmp.lt.s32.totalorder %v3124_v27, 600 }
 0x180   : > { %691 = vmin.xlane.f32.xlu0 %v690_v58  ;;  %946 = vmin.xlane.f32.xlu1 %v945_v52  ;;  %3930 = vst [vmem:[#allocation14_spill] sm:$0xff] %v3146_v50  ;;  %v1340_v58 = vsel %vm1308_vm11, %v1276_v48, 0  ;;  %v1279_v52 = vld [vmem:[%s2472_s8 + $0x20] sm:$0xff]  ;;  %vm1310_vm13 = vmpackc.low %vm1118_vm9, %vm1118_vm9  ;;  %v1341_v19 = vsel %vm1309_vm12, %v1277_v43, 0  ;;  %v3160_v20 = vadd.s32 %v3098_v1, %v1058_v7  ;;  %vm3871_vm1 = vcmp.lt.s32.totalorder %v3135_v38, 600 }
 0x181   : > { %v3084_v37 = vpop.xlane.xlu1 %702  ;;  %v1342_v63 = vsel %vm1310_vm13, %v1278_v25, 0  ;;  %vm1311_vm15 = vmpackc.low %vm3877_vm10, %vm3877_vm10  ;;  %vm3870_vm3 = vcmp.lt.s32.totalorder %v3143_v13, 600  ;;  %v3173_v33 = vadd.s32 %v3098_v1, %v1059_v6  ;;  %vm3869_vm8 = vcmp.lt.s32.totalorder %v3146_v50, 600 }
 0x182   : > { %3927 = vst [vmem:[#allocation12_spill] sm:$0xff] %v3084_v37  ;;  %vm704_vm4 = vcmp.eq.f32.partialorder %v3928_v56, %v3084_v37  ;;  %v2133_v56 = vcombine.high %v1339_v22, %v1340_v58  ;;  %3931 = vst [vmem:[#allocation13_spill] sm:$0xff] %v3160_v20  ;;  %v2135_v9 = vcombine.high %v1341_v19, %v1342_v63  ;;  %v1343_v42 = vsel %vm1311_vm15, %v1279_v52, 0 }
 0x183   : > { %v705_v26 = vsel %vm704_vm4, %v700_v10, inf  ;;  %v1060_v10 = vadd.s32 88, %v3089_v4  ;;  %vm1312_vm2 = vmpackc.low %vm3874_vm14, %vm3874_vm14  ;;  %3932 = vst [vmem:[#allocation15_spill] sm:$0xff] %v3173_v33  ;;  %v2134_v7 = vcombine.low %v1341_v19, %v1342_v63  ;;  %vm3854_vm12 = vcmp.lt.s32.totalorder %v3160_v20, 600 }
 0x184   : > { %706 = vmin.xlane.f32.xlu1 %v705_v26  ;;  %v2132_v26 = vcombine.low %v1339_v22, %v1340_v58  ;;  %1587 = vmatprep.subr.bf16.mxu0 %v2133_v56  ;;  %v1344_v46 = vsel %vm1312_vm2, %v1280_v55, 0  ;;  %vm1313_vm4 = vmpackc.low %vm3871_vm1, %vm3871_vm1  ;;  %v1061_v22 = vadd.s32 96, %v3089_v4  ;;  %v1062_v25 = vadd.s32 104, %v3089_v4 }
 0x185   : > { %2194 = vmatprep.subr.bf16.mxu1 %v2133_v56  ;;  %v3180_v48 = vadd.s32 %v3098_v1, %v1060_v10  ;;  %v2137_v43 = vcombine.high %v1343_v42, %v1344_v46  ;;  %vm1314_vm11 = vmpackc.low %vm3870_vm3, %vm3870_vm3  ;;  %v1345_v6 = vsel %vm1313_vm4, %v1281_v34, 0  ;;  %v1283_v10 = vld [vmem:[%s2472_s8 + $0x40] sm:$0xff]  ;;  %v1284_v56 = vld [vmem:[%s2472_s8 + $0x48] sm:$0xff]  ;;  %vm3858_vm2 = vcmp.lt.s32.totalorder %v3173_v33, 600 }
 0x186   : > { %1588 = vmatpush1.bf16.msra.mxu0 %v2132_v26  ;;  %2210 = vmatpush1.bf16.msra.mxu1 %v2132_v26  ;;  %v1346_v58 = vsel %vm1314_vm11, %v1282_v8, 0  ;;  %vm3191_vm13 = vmpackc.low %vm3869_vm8, %vm3869_vm8  ;;  %v2136_v26 = vcombine.low %v1343_v42, %v1344_v46  ;;  %v3203_v19 = vadd.s32 %v3098_v1, %v1061_v22  ;;  %v1063_v55 = vadd.s32 112, %v3089_v4  ;;  %v1285_v46 = vld [vmem:[%s2472_s8 + $0x50] sm:$0xff]  ;;  %v1286_v22 = vld [vmem:[%s2472_s8 + $0x58] sm:$0xff] }
 0x187   : > { %3933 = vst [vmem:[#allocation16_spill] sm:$0xff] %v3180_v48  ;;  %1589 = vmatprep.subr.bf16.mxu0 %v2135_v9  ;;  %2195 = vmatprep.subr.bf16.mxu1 %v2135_v9  ;;  %vm1316_vm15 = vmpackc.low %vm3854_vm12, %vm3854_vm12  ;;  %vm3857_vm4 = vcmp.lt.s32.totalorder %v3180_v48, 600  ;;  %v2139_v63 = vcombine.high %v1345_v6, %v1346_v58  ;;  %v3207_v9 = vadd.s32 %v3098_v1, %v1062_v25  ;;  %v1064_v34 = vadd.s32 120, %v3089_v4 }
 0x188   : > { %3936 = vst [vmem:[#allocation17_spill] sm:$0xff] %v3203_v19  ;;  %v1347_v8 = vsel %vm3191_vm13, %v1283_v10, 0  ;;  %vm3215_vm11 = vmpackc.low %vm3858_vm2, %vm3858_vm2  ;;  %v2138_v25 = vcombine.low %v1345_v6, %v1346_v58  ;;  %v1066_v52 = vadd.s32 136, %v3089_v4  ;;  %vm3862_vm13 = vcmp.lt.s32.totalorder %v3203_v19, 600  ;;  %v1287_v58 = vld [vmem:[%s2472_s8 + $0x60] sm:$0xff] }
 0x189   : > { %3937 = vst [vmem:[#allocation18_spill] sm:$0xff] %v3207_v9  ;;  %vm1318_vm12 = vmpackc.low %vm3857_vm4, %vm3857_vm4  ;;  %v3228_v10 = vadd.s32 %v3098_v1, %v1063_v55  ;;  %v3232_v37 = vadd.s32 %v3098_v1, %v1064_v34  ;;  %v1349_v39 = vsel %vm3215_vm11, %v1285_v46, 0  ;;  %v1288_v55 = vld [vmem:[%s2472_s8 + $0x68] sm:$0xff]  ;;  %v1067_v46 = vadd.s32 144, %v3089_v4 }
 0x18a   : > { %1590 = vmatpush1.bf16.msra.mxu0 %v2134_v7  ;;  %2211 = vmatpush1.bf16.msra.mxu1 %v2134_v7  ;;  %v1348_v7 = vsel %vm1316_vm15, %v1284_v56, 0  ;;  %vm3861_vm15 = vcmp.lt.s32.totalorder %v3207_v9, 600  ;;  %vm3239_vm4 = vmpackc.low %vm3862_vm13, %vm3862_vm13  ;;  %v3252_v42 = vadd.s32 %v3098_v1, %v1066_v52  ;;  %v1068_v9 = vadd.s32 152, %v3089_v4 }
 0x18b   : > { %1591 = vmatprep.subr.bf16.mxu0 %v2137_v43  ;;  %2196 = vmatprep.subr.bf16.mxu1 %v2137_v43  ;;  %v1065_v43 = vadd.s32 128, %v3089_v4  ;;  %3940 = vst [vmem:[#allocation19_spill] sm:$0xff] %v3228_v10  ;;  %v2141_v56 = vcombine.high %v1347_v8, %v1348_v7  ;;  %3941 = vst [vmem:[#allocation20_spill] sm:$0xff] %v3232_v37  ;;  %v2140_v34 = vcombine.low %v1347_v8, %v1348_v7  ;;  %v1289_v7 = vld [vmem:[%s2472_s8 + $0x70] sm:$0xff] }
 0x18c   : > { %vm1320_vm2 = vmpackc.low %vm3861_vm15, %vm3861_vm15  ;;  %vm3865_vm11 = vcmp.lt.s32.totalorder %v3232_v37, 600  ;;  %v1069_v52 = vadd.s32 160, %v3089_v4  ;;  %v3275_v6 = vadd.s32 %v3098_v1, %v1067_v46  ;;  %v3280_v37 = vadd.s32 %v3098_v1, %v1068_v9  ;;  %v1292_v46 = vld [vmem:[%s2472_s8 + $0x88] sm:$0xff] }
 0x18d   : > { %v1352_v19 = vsel %vm1320_vm2, %v1288_v55, 0  ;;  %vm1322_vm13 = vmpackc.low %vm3865_vm11, %vm3865_vm11  ;;  %v1072_v53 = vadd.s32 184, %v3089_v4  ;;  %v1074_v35 = vadd.s32 200, %v3089_v4  ;;  %v1078_v30 = vadd.s32 232, %v3089_v4 }
 0x18e   : > { %1592 = vmatpush1.bf16.msra.mxu0 %v2136_v26  ;;  %2212 = vmatpush1.bf16.msra.mxu1 %v2136_v26  ;;  %v1350_v26 = vsel %vm1318_vm12, %v1286_v22, 0  ;;  %vm3866_vm12 = vcmp.lt.s32.totalorder %v3228_v10, 600  ;;  %v3297_v9 = vadd.s32 %v3098_v1, %v1069_v52  ;;  %v1080_v0 = vadd.s32 248, %v3089_v4 }
 0x18f   : > { %1593 = vmatprep.subr.bf16.mxu0 %v2139_v63  ;;  %2197 = vmatprep.subr.bf16.mxu1 %v2139_v63  ;;  %v3249_v63 = vadd.s32 %v3098_v1, %v1065_v43  ;;  %v2143_v22 = vcombine.high %v1349_v39, %v1350_v26  ;;  %v1351_v43 = vsel %vm3239_vm4, %v1287_v58, 0  ;;  %vm3263_vm15 = vmpackc.low %vm3866_vm12, %vm3866_vm12  ;;  %v1070_v58 = vadd.s32 168, %v3089_v4 }
 0x190   : > { %v2145_v55 = vcombine.high %v1351_v43, %v1352_v19  ;;  %vm1132_vm4 = vcmp.lt.s32.totalorder %v3252_v42, 600  ;;  %v1353_v10 = vsel %vm3263_vm15, %v1289_v7, 0  ;;  %v1071_v7 = vadd.s32 176, %v3089_v4 }
 0x191   : > { %vm1131_vm2 = vcmp.lt.s32.totalorder %v3249_v63, 600  ;;  %vm1324_vm12 = vmpackc.low %vm1132_vm4, %vm1132_vm4  ;;  %v3301_v8 = vadd.s32 %v3098_v1, %v1070_v58  ;;  %vm1134_vm15 = vcmp.lt.s32.totalorder %v3280_v37, 600  ;;  %vm3883_vm1 = vcmp.lt.s32.totalorder %v3297_v9, 600 }
 0x192   : > { %1594 = vmatpush1.bf16.msra.mxu0 %v2138_v25  ;;  %2213 = vmatpush1.bf16.msra.mxu1 %v2138_v25  ;;  %v1290_v25 = vld [vmem:[%s2472_s8 + $0x78] sm:$0xff]  ;;  %vm3287_vm11 = vmpackc.low %vm1131_vm2, %vm1131_vm2  ;;  %v1356_v48 = vsel %vm1324_vm12, %v1292_v46, 0  ;;  %v3327_v46 = vadd.s32 %v3098_v1, %v1072_v53  ;;  %v1075_v53 = vadd.s32 208, %v3089_v4  ;;  %v3352_v18 = vadd.s32 %v3098_v1, %v1074_v35 }
 0x193   : > { %1595 = vmatprep.subr.bf16.mxu0 %v2141_v56  ;;  %2198 = vmatprep.subr.bf16.mxu1 %v2141_v56  ;;  %v2142_v56 = vcombine.low %v1349_v39, %v1350_v26  ;;  %v1291_v26 = vld [vmem:[%s2472_s8 + $0x80] sm:$0xff]  ;;  %vm1326_vm3 = vmpackc.low %vm1134_vm15, %vm1134_vm15  ;;  %vm3878_vm12 = vcmp.lt.s32.totalorder %v3301_v8, 600  ;;  %v1073_v39 = vadd.s32 192, %v3089_v4 }
 0x194   : > { %v1355_v52 = vsel %vm3287_vm11, %v1291_v26, 0  ;;  %vm3335_vm11 = vmpackc.low %vm3883_vm1, %vm3883_vm1  ;;  %v3369_v35 = vadd.s32 %v3098_v1, %v1075_v53 }
 0x195   : > { %v2149_v26 = vcombine.high %v1355_v52, %v1356_v48  ;;  %vm1328_vm14 = vmpackc.low %vm3878_vm12, %vm3878_vm12 }
 0x196   : > { %1596 = vmatpush1.bf16.msra.mxu0 %v2140_v34  ;;  %2214 = vmatpush1.bf16.msra.mxu1 %v2140_v34  ;;  %v1354_v34 = vsel %vm1322_vm13, %v1290_v25, 0  ;;  %vm1133_vm13 = vcmp.lt.s32.totalorder %v3275_v6, 600  ;;  %3954 = vst [vmem:[#allocation21_spill] sm:$0xff] %v3369_v35  ;;  %vm1141_vm1 = vcmp.lt.s32.totalorder %v3369_v35, 600 }
 0x197   : > { %1597 = vmatprep.subr.bf16.mxu0 %v2143_v22  ;;  %2199 = vmatprep.subr.bf16.mxu1 %v2143_v22  ;;  %v2144_v22 = vcombine.low %v1351_v43, %v1352_v19  ;;  %v2147_v25 = vcombine.high %v1353_v10, %v1354_v34  ;;  %vm3311_vm8 = vmpackc.low %vm1133_vm13, %vm1133_vm13  ;;  %v1293_v43 = vld [vmem:[%s2472_s8 + $0x90] sm:$0xff]  ;;  %v2146_v58 = vcombine.low %v1353_v10, %v1354_v34  ;;  %v1295_v34 = vld [vmem:[%s2472_s8 + $0xa0] sm:$0xff] }
 0x198   : > { %v1357_v33 = vsel %vm3311_vm8, %v1293_v43, 0  ;;  %v3347_v19 = vadd.s32 %v3098_v1, %v1073_v39  ;;  %v1076_v43 = vadd.s32 216, %v3089_v4  ;;  %vm3881_vm8 = vcmp.lt.s32.totalorder %v3327_v46, 600  ;;  %v1298_v39 = vld [vmem:[%s2472_s8 + $0xb8] sm:$0xff] }
 0x199   : > { %v1359_v21 = vsel %vm3335_vm11, %v1295_v34, 0  ;;  %vm1330_vm12 = vmpackc.low %vm3881_vm8, %vm3881_vm8  ;;  %v1077_v34 = vadd.s32 224, %v3089_v4  ;;  %vm3886_vm11 = vcmp.lt.s32.totalorder %v3352_v18, 600 }
 0x19a   : > { %1598 = vmatpush1.bf16.msra.mxu0 %v2142_v56  ;;  %2215 = vmatpush1.bf16.msra.mxu1 %v2142_v56  ;;  %v1294_v56 = vld [vmem:[%s2472_s8 + $0x98] sm:$0xff]  ;;  %v3373_v10 = vadd.s32 %v3098_v1, %v1076_v43  ;;  %v1362_v20 = vsel %vm1330_vm12, %v1298_v39, 0  ;;  %v3399_v39 = vadd.s32 %v3098_v1, %v1078_v30  ;;  %vm1333_vm12 = vmpackc.low %vm1141_vm1, %vm1141_vm1 }
 0x19b   : > { %1599 = vmatprep.subr.bf16.mxu0 %v2145_v55  ;;  %2200 = vmatprep.subr.bf16.mxu1 %v2145_v55  ;;  %v3323_v55 = vadd.s32 %v3098_v1, %v1071_v7  ;;  %v1296_v7 = vld [vmem:[%s2472_s8 + $0xa8] sm:$0xff] }
 0x19c   : > { %3955 = vst [vmem:[#allocation22_spill] sm:$0xff] %v3373_v10  ;;  %3959 = vst [vmem:[#allocation24_spill] sm:$0xff] %v3399_v39 }
 0x19e   : > { %1600 = vmatpush1.bf16.msra.mxu0 %v2144_v22  ;;  %2216 = vmatpush1.bf16.msra.mxu1 %v2144_v22  ;;  %v1358_v22 = vsel %vm1326_vm3, %v1294_v56, 0  ;;  %vm3882_vm3 = vcmp.lt.s32.totalorder %v3323_v55, 600 }
 0x19f   : > { %1601 = vmatprep.subr.bf16.mxu0 %v2147_v25  ;;  %2201 = vmatprep.subr.bf16.mxu1 %v2147_v25  ;;  %v2148_v25 = vcombine.low %v1355_v52, %v1356_v48  ;;  %v2151_v56 = vcombine.high %v1357_v33, %v1358_v22  ;;  %vm3359_vm10 = vmpackc.low %vm3882_vm3, %vm3882_vm3  ;;  %v1297_v52 = vld [vmem:[%s2472_s8 + $0xb0] sm:$0xff]  ;;  %v1079_v48 = vadd.s32 240, %v3089_v4 }
 0x1a0   : > { %v1361_v53 = vsel %vm3359_vm10, %v1297_v52, 0  ;;  %vm1332_vm3 = vmpackc.low %vm3886_vm11, %vm3886_vm11  ;;  %vm3888_vm10 = vcmp.lt.s32.totalorder %v3373_v10, 600 }
 0x1a1   : > { %v2155_v52 = vcombine.high %v1361_v53, %v1362_v20  ;;  %vm1334_vm11 = vmpackc.low %vm3888_vm10, %vm3888_vm10  ;;  %v2154_v30 = vcombine.low %v1361_v53, %v1362_v20  ;;  %v3414_v4 = vadd.s32 %v3098_v1, %v1079_v48  ;;  %v1303_v20 = vld [vmem:[%s2472_s8 + $0xe0] sm:$0xff]  ;;  %v1304_v53 = vld [vmem:[%s2472_s8 + $0xe8] sm:$0xff] }
 0x1a2   : > { %1602 = vmatpush1.bf16.msra.mxu0 %v2146_v58  ;;  %2217 = vmatpush1.bf16.msra.mxu1 %v2146_v58  ;;  %v1360_v58 = vsel %vm1328_vm14, %v1296_v7, 0  ;;  %vm3887_vm14 = vcmp.lt.s32.totalorder %v3347_v19, 600 }
 0x1a3   : > { %1603 = vmatprep.subr.bf16.mxu0 %v2149_v26  ;;  %2202 = vmatprep.subr.bf16.mxu1 %v2149_v26  ;;  %v2150_v26 = vcombine.low %v1357_v33, %v1358_v22  ;;  %v2153_v7 = vcombine.high %v1359_v21, %v1360_v58  ;;  %vm3383_vm8 = vmpackc.low %vm3887_vm14, %vm3887_vm14  ;;  %v1299_v22 = vld [vmem:[%s2472_s8 + $0xc0] sm:$0xff]  ;;  %v2152_v43 = vcombine.low %v1359_v21, %v1360_v58  ;;  %v1301_v21 = vld [vmem:[%s2472_s8 + $0xd0] sm:$0xff] }
 0x1a4   : > { %v1363_v50 = vsel %vm3383_vm8, %v1299_v22, 0  ;;  %v1302_v58 = vld [vmem:[%s2472_s8 + $0xd8] sm:$0xff]  ;;  %3960 = vst [vmem:[#allocation25_spill] sm:$0xff] %v3414_v4  ;;  %v1365_v33 = vsel %vm1333_vm12, %v1301_v21, 0  ;;  %vm1145_vm12 = vcmp.lt.s32.totalorder %v3414_v4, 600 }
 0x1a5   : > { %v1366_v22 = vsel %vm1334_vm11, %v1302_v58, 0  ;;  %v1306_v21 = vld [vmem:[%s2472_s8 + $0xf8] sm:$0xff] }
 0x1a6   : > { %1604 = vmatpush1.bf16.msra.mxu0 %v2148_v25  ;;  %2218 = vmatpush1.bf16.msra.mxu1 %v2148_v25  ;;  %v1300_v25 = vld [vmem:[%s2472_s8 + $0xc8] sm:$0xff]  ;;  %v2158_v58 = vcombine.low %v1365_v33, %v1366_v22 }
 0x1a7   : > { %1605 = vmatprep.subr.bf16.mxu0 %v2151_v56  ;;  %2203 = vmatprep.subr.bf16.mxu1 %v2151_v56  ;;  %v3395_v56 = vadd.s32 %v3098_v1, %v1077_v34 }
 0x1a9   : > { %3958 = vst [vmem:[#allocation23_spill] sm:$0xff] %v3395_v56  ;;  %vm3889_vm14 = vcmp.lt.s32.totalorder %v3395_v56, 600 }
 0x1aa   : > { %1606 = vmatpush1.bf16.msra.mxu0 %v2150_v26  ;;  %2219 = vmatpush1.bf16.msra.mxu1 %v2150_v26  ;;  %v1364_v26 = vsel %vm1332_vm3, %v1300_v25, 0  ;;  %vm3890_vm3 = vcmp.lt.s32.totalorder %v3399_v39, 600  ;;  %vm1335_vm8 = vmpackc.low %vm3889_vm14, %vm3889_vm14  ;;  %v754_v39 = vcvt.f32.s32 %v2945_v28 }
 0x1ab   : > { %1607 = vmatprep.subr.bf16.mxu0 %v2153_v7  ;;  %2204 = vmatprep.subr.bf16.mxu1 %v2153_v7  ;;  %v2157_v34 = vcombine.high %v1363_v50, %v1364_v26  ;;  %v3418_v7 = vadd.s32 %v3098_v1, %v1080_v0  ;;  %vm1336_vm10 = vmpackc.low %vm3890_vm3, %vm3890_vm3  ;;  %v2156_v25 = vcombine.low %v1363_v50, %v1364_v26  ;;  %v724_v0 = vcvt.f32.s32 %v2929_v11 }
 0x1ac   : > { %v2159_v1 = vcombine.high %v1365_v33, %v1366_v22  ;;  %v1368_v48 = vsel %vm1336_vm10, %v1304_v53, 0  ;;  %vm1337_vm14 = vmpackc.low %vm1145_vm12, %vm1145_vm12  ;;  %v484_v11 = vcvt.f32.s32 %v2935_v45  ;;  %v739_v50 = vcvt.f32.s32 %v2937_v62  ;;  %v3962_v33 = vld [vmem:[#allocation4_spill] sm:$0xff] }
 0x1ad   : > { %3961 = vst [vmem:[#allocation26_spill] sm:$0xff] %v3418_v7  ;;  %vm1146_vm11 = vcmp.lt.s32.totalorder %v3418_v7, 600  ;;  %v499_v45 = vcvt.f32.s32 %v2947_v41 }
 0x1ae   : > { %1608 = vmatpush1.bf16.msra.mxu0 %v2152_v43  ;;  %2220 = vmatpush1.bf16.msra.mxu1 %v2152_v43  ;;  %v1367_v43 = vsel %vm1335_vm8, %v1303_v20, 0  ;;  %vm1338_vm3 = vmpackc.low %vm1146_vm11, %vm1146_vm11  ;;  %v485_v56 = vshll.u32 %v484_v11, 16  ;;  %v740_v10 = vshll.u32 %v739_v50, 16 }
 0x1af   : > { %1609 = vmatprep.subr.bf16.mxu0 %v2155_v52  ;;  %2205 = vmatprep.subr.bf16.mxu1 %v2155_v52  ;;  %v1305_v52 = vld [vmem:[%s2472_s8 + $0xf0] sm:$0xff]  ;;  %v2161_v20 = vcombine.high %v1367_v43, %v1368_v48  ;;  %v1370_v4 = vsel %vm1338_vm3, %v1306_v21, 0  ;;  %v755_v21 = vshll.u32 %v754_v39, 16 }
 0x1b0   : > { %v1369_v53 = vsel %vm1337_vm14, %v1305_v52, 0  ;;  %v2406_v52 = vmov 0.0  }
 0x1b2   : > { %1610 = vmatpush1.bf16.msra.mxu0 %v2154_v30  ;;  %2221 = vmatpush1.bf16.msra.mxu1 %v2154_v30  ;;  %v725_v30 = vshll.u32 %v724_v0, 16 }
 0x1b3   : > { %1611 = vmatprep.subr.bf16.mxu0 %v2157_v34  ;;  %2206 = vmatprep.subr.bf16.mxu1 %v2157_v34 }
 0x1b6   : > { %1612 = vmatpush1.bf16.msra.mxu0 %v2156_v25  ;;  %2222 = vmatpush1.bf16.msra.mxu1 %v2156_v25  ;;  %v2160_v25 = vcombine.low %v1367_v43, %v1368_v48  ;;  %v514_v43 = vcvt.f32.s32 %v2955_v49  ;;  %v784_v49 = vcvt.f32.s32 %v2965_v61 }
 0x1b7   : > { %1613 = vmatprep.subr.bf16.mxu0 %v2159_v1  ;;  %2207 = vmatprep.subr.bf16.mxu1 %v2159_v1  ;;  %v2163_v1 = vcombine.high %v1369_v53, %v1370_v4 }
 0x1b8   : > { %v785_v42 = vshll.u32 %v784_v49, 16 }
 0x1ba   : > { %1614 = vmatpush1.bf16.msra.mxu0 %v2158_v58  ;;  %2223 = vmatpush1.bf16.msra.mxu1 %v2158_v58  ;;  %v2162_v58 = vcombine.low %v1369_v53, %v1370_v4 }
 0x1bb   : > { %1615 = vmatprep.subr.bf16.mxu0 %v2161_v20  ;;  %2208 = vmatprep.subr.bf16.mxu1 %v2161_v20  ;;  %v515_v20 = vshll.u32 %v514_v43, 16 }
 0x1be   : > { %1616 = vmatpush1.bf16.msra.mxu0 %v2160_v25  ;;  %2224 = vmatpush1.bf16.msra.mxu1 %v2160_v25 }
 0x1bf   : > { %1617 = vmatprep.subr.bf16.mxu0 %v2163_v1  ;;  %2209 = vmatprep.subr.bf16.mxu1 %v2163_v1 }
 0x1c2   : > { %1618 = vmatpush1.bf16.msra.mxu0 %v2162_v58  ;;  %2225 = vmatpush1.bf16.msra.mxu1 %v2162_v58 }
 0x1d1   : > { %v722_v26 = vpop.xlane.xlu0 %721 }
 0x1d2   : > { %v723_v34 = vcvt.f32.s32 %v722_v26  ;;  %v500_v26 = vshll.u32 %v499_v45, 16  ;;  %v529_v45 = vcvt.f32.s32 %v2967_v15 }
 0x1d4   : > { %v726_v7 = vadd.s32 %v725_v30, %v723_v34 }
 0x1d5   : > { %v482_v35 = vpop.xlane.xlu0 %481  ;;  %v737_v62 = vpop.xlane.xlu1 %736 }
 0x1d6   : > { %vm968_vm10 = vcmp.eq.s32.totalorder %v3962_v33, %v726_v7  ;;  %v483_v22 = vcvt.f32.s32 %v482_v35  ;;  %v738_v0 = vcvt.f32.s32 %v737_v62  ;;  %v769_v7 = vcvt.f32.s32 %v2957_v57 }
 0x1d7   : > { %v2115_v28 = vsel %vm968_vm10, 1.0, %v2406_v52 }
 0x1d8   : > { %v486_v11 = vadd.s32 %v485_v56, %v483_v22  ;;  %v741_v50 = vadd.s32 %v740_v10, %v738_v0  ;;  %v1227_v41 = vsel %vm1131_vm2, %v2115_v28, 0.0  ;;  %v770_v53 = vshll.u32 %v769_v7, 16 }
 0x1d9   : > { %v752_v35 = vpop.xlane.xlu0 %751  ;;  %v497_v48 = vpop.xlane.xlu1 %496  ;;  %1259 = vst.msk [vmem:[%s2474_s9 + $0x80] sm:$0xff] %vm311_vm0, %v1227_v41 }
 0x1da   : > { %vm952_vm14 = vcmp.eq.s32.totalorder %v3962_v33, %v486_v11  ;;  %vm969_vm3 = vcmp.eq.s32.totalorder %v3962_v33, %v741_v50  ;;  %v753_v10 = vcvt.f32.s32 %v752_v35  ;;  %v498_v56 = vcvt.f32.s32 %v497_v48 }
 0x1db   : > { %v2099_v57 = vsel %vm952_vm14, 1.0, %v2406_v52  ;;  %v2116_v63 = vsel %vm969_vm3, 1.0, %v2406_v52  ;;  %v530_v50 = vshll.u32 %v529_v45, 16  ;;  %v814_v48 = vcvt.f32.s32 %v2985_v2 }
 0x1dc   : > { %v756_v39 = vadd.s32 %v755_v21, %v753_v10  ;;  %v501_v30 = vadd.s32 %v500_v26, %v498_v56  ;;  %v1228_v4 = vsel %vm1132_vm4, %v2116_v63, 0.0  ;;  %v1211_v34 = vsel %vm1115_vm5, %v2099_v57, 0.0 }
 0x1dd   : > { %v512_v62 = vpop.xlane.xlu0 %511  ;;  %v767_v25 = vpop.xlane.xlu1 %766  ;;  %v1387_v22 = vpack.c.bf16 %v1228_v4, %v1227_v41  ;;  %1260 = vst.msk [vmem:[%s2474_s9 + $0x88] sm:$0xff] %vm311_vm0, %v1228_v4  ;;  %1243 = vst.msk [vmem:[%s2474_s9] sm:$0xff] %vm311_vm0, %v1211_v34  ;;  %v544_v41 = vcvt.f32.s32 %v2975_v32  ;;  %v799_v26 = vcvt.f32.s32 %v2977_v5  ;;  %v815_v29 = vshll.u32 %v814_v48, 16 }
 0x1de   : > { %vm970_vm2 = vcmp.eq.s32.totalorder %v3962_v33, %v756_v39  ;;  %vm953_vm4 = vcmp.eq.s32.totalorder %v3962_v33, %v501_v30  ;;  %v513_v61 = vcvt.f32.s32 %v512_v62  ;;  %v768_v44 = vcvt.f32.s32 %v767_v25 }
 0x1df   : > { %v2117_v15 = vsel %vm970_vm2, 1.0, %v2406_v52  ;;  %v2100_v0 = vsel %vm953_vm4, 1.0, %v2406_v52  ;;  %1411 = vxpose.xlu0.c.b16.start [1/8] (narrow) %v1387_v22, 32  ;;  %v545_v57 = vshll.u32 %v544_v41, 16  ;;  %v800_v63 = vshll.u32 %v799_v26, 16 }
 0x1e0   : > { %v516_v1 = vadd.s32 %v515_v20, %v513_v61  ;;  %v771_v28 = vadd.s32 %v770_v53, %v768_v44  ;;  %v1212_v21 = vsel %vm1116_vm6, %v2100_v0, 0.0  ;;  %v1229_v11 = vsel %vm1133_vm13, %v2117_v15, 0.0 }
 0x1e1   : > { %v782_v43 = vpop.xlane.xlu0 %781  ;;  %v527_v7 = vpop.xlane.xlu1 %526  ;;  %v1379_v35 = vpack.c.bf16 %v1212_v21, %v1211_v34  ;;  %1244 = vst.msk [vmem:[%s2474_s9 + $0x8] sm:$0xff] %vm311_vm0, %v1212_v21  ;;  %1261 = vst.msk [vmem:[%s2474_s9 + $0x90] sm:$0xff] %vm311_vm0, %v1229_v11  ;;  %v559_v39 = vcvt.f32.s32 %v2987_v40  ;;  %v574_v61 = vcvt.f32.s32 %v2995_v60  ;;  %v829_v44 = vcvt.f32.s32 %v2997_v47 }
 0x1e2   : > { %vm954_vm5 = vcmp.eq.s32.totalorder %v3962_v33, %v516_v1  ;;  %vm971_vm8 = vcmp.eq.s32.totalorder %v3962_v33, %v771_v28  ;;  %v783_v31 = vcvt.f32.s32 %v782_v43  ;;  %v528_v6 = vcvt.f32.s32 %v527_v7 }
 0x1e3   : > { %v2101_v32 = vsel %vm954_vm5, 1.0, %v2406_v52  ;;  %v2118_v5 = vsel %vm971_vm8, 1.0, %v2406_v52  ;;  %1395 = vxpose.xlu1.c.b16.start [1/8] (narrow) %v1379_v35, 32  ;;  %v560_v22 = vshll.u32 %v559_v39, 16  ;;  %v844_v1 = vcvt.f32.s32 %v3005_v16 }
 0x1e4   : > { %v786_v58 = vadd.s32 %v785_v42, %v783_v31  ;;  %v531_v10 = vadd.s32 %v530_v50, %v528_v6  ;;  %v1230_v56 = vsel %vm1134_vm15, %v2118_v5, 0.0  ;;  %v1213_v49 = vsel %vm1117_vm7, %v2101_v32, 0.0 }
 0x1e5   : > { %v542_v30 = vpop.xlane.xlu0 %541  ;;  %v797_v4 = vpop.xlane.xlu1 %796  ;;  %v1388_v2 = vpack.c.bf16 %v1230_v56, %v1229_v11  ;;  %1262 = vst.msk [vmem:[%s2474_s9 + $0x98] sm:$0xff] %vm311_vm0, %v1230_v56  ;;  %1245 = vst.msk [vmem:[%s2474_s9 + $0x10] sm:$0xff] %vm311_vm0, %v1213_v49  ;;  %vm3963_vm7 = vcmp.lt.s32.totalorder %v3297_v9, 600  ;;  %vm3965_vm14 = vcmp.lt.s32.totalorder %v3115_v51, 600  ;;  %v575_v41 = vshll.u32 %v574_v61, 16 }
 0x1e6   : > { %vm972_vm6 = vcmp.eq.s32.totalorder %v3962_v33, %v786_v58  ;;  %vm955_vm13 = vcmp.eq.s32.totalorder %v3962_v33, %v531_v10  ;;  %v543_v37 = vcvt.f32.s32 %v542_v30  ;;  %v798_v34 = vcvt.f32.s32 %v797_v4 }
 0x1e7   : > { %v2119_v20 = vsel %vm972_vm6, 1.0, %v2406_v52  ;;  %v2102_v40 = vsel %vm955_vm13, 1.0, %v2406_v52  ;;  %1412 = vxpose.xlu0.c.b16.cont [2/8] (narrow) %v1388_v2, 32  ;;  %v830_v26 = vshll.u32 %v829_v44, 16  ;;  %v589_v43 = vcvt.f32.s32 %v3007_v3 }
 0x1e8   : > { %v546_v53 = vadd.s32 %v545_v57, %v543_v37  ;;  %v801_v45 = vadd.s32 %v800_v63, %v798_v34  ;;  %v1214_v62 = vsel %vm1118_vm9, %v2102_v40, 0.0  ;;  %v1231_v25 = vsel %vm3963_vm7, %v2119_v20, 0.0 }
 0x1e9   : > { %v812_v42 = vpop.xlane.xlu0 %811  ;;  %v557_v15 = vpop.xlane.xlu1 %556  ;;  %v1380_v0 = vpack.c.bf16 %v1214_v62, %v1213_v49  ;;  %1246 = vst.msk [vmem:[%s2474_s9 + $0x18] sm:$0xff] %vm311_vm0, %v1214_v62  ;;  %1263 = vst.msk [vmem:[%s2474_s9 + $0xa0] sm:$0xff] %vm311_vm0, %v1231_v25  ;;  %vm3964_vm9 = vcmp.lt.s32.totalorder %v3301_v8, 600  ;;  %v845_v51 = vshll.u32 %v844_v1, 16  ;;  %vm3966_vm4 = vcmp.lt.s32.totalorder %v3124_v27, 600 }
 0x1ea   : > { %vm956_vm15 = vcmp.eq.s32.totalorder %v3962_v33, %v546_v53  ;;  %vm973_vm10 = vcmp.eq.s32.totalorder %v3962_v33, %v801_v45  ;;  %v813_v24 = vcvt.f32.s32 %v812_v42  ;;  %v558_v9 = vcvt.f32.s32 %v557_v15 }
 0x1eb   : > { %v2103_v60 = vsel %vm956_vm15, 1.0, %v2406_v52  ;;  %v2120_v47 = vsel %vm973_vm10, 1.0, %v2406_v52  ;;  %1396 = vxpose.xlu1.c.b16.cont [2/8] (narrow) %v1380_v0, 32  ;;  %vm3967_vm5 = vcmp.lt.s32.totalorder %v3323_v55, 600  ;;  %v590_v10 = vshll.u32 %v589_v43, 16 }
 0x1ec   : > { %v816_v28 = vadd.s32 %v815_v29, %v813_v24  ;;  %v561_v21 = vadd.s32 %v560_v22, %v558_v9  ;;  %v1232_v11 = vsel %vm3964_vm9, %v2120_v47, 0.0  ;;  %v1215_v50 = vsel %vm3965_vm14, %v2103_v60, 0.0 }
 0x1ed   : > { %v572_v7 = vpop.xlane.xlu0 %571  ;;  %v827_v35 = vpop.xlane.xlu1 %826  ;;  %v1389_v16 = vpack.c.bf16 %v1232_v11, %v1231_v25  ;;  %1264 = vst.msk [vmem:[%s2474_s9 + $0xa8] sm:$0xff] %vm311_vm0, %v1232_v11  ;;  %1247 = vst.msk [vmem:[%s2474_s9 + $0x20] sm:$0xff] %vm311_vm0, %v1215_v50  ;;  %v604_v56 = vcvt.f32.s32 %v3015_v14  ;;  %v859_v49 = vcvt.f32.s32 %v3017_v12  ;;  %v874_v30 = vcvt.f32.s32 %v3025_v36 }
 0x1ee   : > { %vm974_vm3 = vcmp.eq.s32.totalorder %v3962_v33, %v816_v28  ;;  %vm957_vm2 = vcmp.eq.s32.totalorder %v3962_v33, %v561_v21  ;;  %v573_v8 = vcvt.f32.s32 %v572_v7  ;;  %v828_v31 = vcvt.f32.s32 %v827_v35  ;;  %v3975_v7 = vld [vmem:[#allocation5_spill] sm:$0xff] }
 0x1ef   : > { %v2121_v6 = vsel %vm974_vm3, 1.0, %v2406_v52  ;;  %v2104_v3 = vsel %vm957_vm2, 1.0, %v2406_v52  ;;  %1413 = vxpose.xlu0.c.b16.cont [3/8] (narrow) %v1389_v16, 32  ;;  %vm3968_vm13 = vcmp.lt.s32.totalorder %v3327_v46, 600  ;;  %vm3969_vm7 = vcmp.lt.s32.totalorder %v3135_v38, 600 }
 0x1f0   : > { %v576_v48 = vadd.s32 %v575_v41, %v573_v8  ;;  %v831_v32 = vadd.s32 %v830_v26, %v828_v31  ;;  %v1216_v5 = vsel %vm3966_vm4, %v2104_v3, 0.0  ;;  %v1233_v58 = vsel %vm3967_vm5, %v2121_v6, 0.0 }
 0x1f1   : > { %v842_v57 = vpop.xlane.xlu0 %841  ;;  %v587_v63 = vpop.xlane.xlu1 %586  ;;  %v1381_v39 = vpack.c.bf16 %v1216_v5, %v1215_v50  ;;  %1248 = vst.msk [vmem:[%s2474_s9 + $0x28] sm:$0xff] %vm311_vm0, %v1216_v5  ;;  %1265 = vst.msk [vmem:[%s2474_s9 + $0xb0] sm:$0xff] %vm311_vm0, %v1233_v58  ;;  %v605_v29 = vshll.u32 %v604_v56, 16  ;;  %v860_v20 = vshll.u32 %v859_v49, 16  ;;  %v619_v40 = vcvt.f32.s32 %v3027_v23  ;;  %v3973_v50 = vld [vmem:[#allocation14_spill] sm:$0xff]  ;;  %v3976_v5 = vld [vmem:[#allocation13_spill] sm:$0xff] }
 0x1f2   : > { %vm958_vm8 = vcmp.eq.s32.totalorder %v3962_v33, %v576_v48  ;;  %vm975_vm6 = vcmp.eq.s32.totalorder %v3962_v33, %v831_v32  ;;  %v843_v27 = vcvt.f32.s32 %v842_v57  ;;  %v588_v55 = vcvt.f32.s32 %v587_v63  ;;  %v3979_v57 = vld [vmem:[#allocation7_spill] sm:$0xff] }
 0x1f3   : > { %v2105_v14 = vsel %vm958_vm8, 1.0, %v2406_v52  ;;  %v2122_v12 = vsel %vm975_vm6, 1.0, %v2406_v52  ;;  %1397 = vxpose.xlu1.c.b16.cont [3/8] (narrow) %v1381_v39, 32  ;;  %v875_v38 = vshll.u32 %v874_v30, 16  ;;  %vm3970_vm9 = vcmp.lt.s32.totalorder %v3143_v13, 600  ;;  %v3980_v39 = vld [vmem:[#allocation6_spill] sm:$0xff] }
 0x1f4   : > { %v846_v4 = vadd.s32 %v845_v51, %v843_v27  ;;  %v591_v2 = vadd.s32 %v590_v10, %v588_v55  ;;  %v1234_v37 = vsel %vm3968_vm13, %v2122_v12, 0.0  ;;  %v1217_v34 = vsel %vm3969_vm7, %v2105_v14, 0.0 }
 0x1f5   : > { %v602_v53 = vpop.xlane.xlu0 %601  ;;  %v857_v45 = vpop.xlane.xlu1 %856  ;;  %v1390_v36 = vpack.c.bf16 %v1234_v37, %v1233_v58  ;;  %1266 = vst.msk [vmem:[%s2474_s9 + $0xb8] sm:$0xff] %vm311_vm0, %v1234_v37  ;;  %1249 = vst.msk [vmem:[%s2474_s9 + $0x30] sm:$0xff] %vm311_vm0, %v1217_v34  ;;  %vm3971_vm14 = vcmp.lt.s32.totalorder %v3347_v19, 600  ;;  %v620_v15 = vshll.u32 %v619_v40, 16  ;;  %v634_v0 = vcvt.f32.s32 %v3035_v54 }
 0x1f6   : > { %vm976_vm15 = vcmp.eq.s32.totalorder %v3962_v33, %v846_v4  ;;  %vm959_vm10 = vcmp.eq.s32.totalorder %v3962_v33, %v591_v2  ;;  %v603_v46 = vcvt.f32.s32 %v602_v53  ;;  %v858_v62 = vcvt.f32.s32 %v857_v45  ;;  %v3981_v2 = vld [vmem:[#allocation9_spill] sm:$0xff]  ;;  %v3982_v53 = vld [vmem:[#allocation22_spill] sm:$0xff] }
 0x1f7   : > { %v2123_v25 = vsel %vm976_vm15, 1.0, %v2406_v52  ;;  %v2106_v23 = vsel %vm959_vm10, 1.0, %v2406_v52  ;;  %1414 = vxpose.xlu0.c.b16.cont [4/8] (narrow) %v1390_v36, 32  ;;  %v889_v24 = vcvt.f32.s32 %v3037_v59  ;;  %v904_v47 = vcvt.f32.s32 %v3045_v17  ;;  %v3984_v36 = vld [vmem:[#allocation15_spill] sm:$0xff] }
 0x1f8   : > { %v606_v22 = vadd.s32 %v605_v29, %v603_v46  ;;  %v861_v61 = vadd.s32 %v860_v20, %v858_v62  ;;  %v1218_v44 = vsel %vm3970_vm9, %v2106_v23, 0.0  ;;  %v1235_v42 = vsel %vm3971_vm14, %v2123_v25, 0.0  ;;  %v3986_v25 = vld [vmem:[#allocation8_spill] sm:$0xff] }
 0x1f9   : > { %v872_v9 = vpop.xlane.xlu0 %871  ;;  %v617_v1 = vpop.xlane.xlu1 %616  ;;  %v1382_v60 = vpack.c.bf16 %v1218_v44, %v1217_v34  ;;  %1250 = vst.msk [vmem:[%s2474_s9 + $0x38] sm:$0xff] %vm311_vm0, %v1218_v44  ;;  %1267 = vst.msk [vmem:[%s2474_s9 + $0xc0] sm:$0xff] %vm311_vm0, %v1235_v42  ;;  %vm3972_vm4 = vcmp.lt.s32.totalorder %v3352_v18, 600  ;;  %vm3974_vm5 = vcmp.lt.s32.totalorder %v3973_v50, 600  ;;  %v635_v26 = vshll.u32 %v634_v0, 16 }
 0x1fa   : > { %vm960_vm3 = vcmp.eq.s32.totalorder %v3962_v33, %v606_v22  ;;  %vm977_vm2 = vcmp.eq.s32.totalorder %v3962_v33, %v861_v61  ;;  %v873_v13 = vcvt.f32.s32 %v872_v9  ;;  %v618_v19 = vcvt.f32.s32 %v617_v1 }
 0x1fb   : > { %v2107_v54 = vsel %vm960_vm3, 1.0, %v2406_v52  ;;  %v2124_v59 = vsel %vm977_vm2, 1.0, %v2406_v52  ;;  %1398 = vxpose.xlu1.c.b16.cont [4/8] (narrow) %v1382_v60, 32  ;;  %v890_v43 = vshll.u32 %v889_v24, 16  ;;  %v649_v35 = vcvt.f32.s32 %v3975_v7 }
 0x1fc   : > { %v876_v28 = vadd.s32 %v875_v38, %v873_v13  ;;  %v621_v21 = vadd.s32 %v620_v15, %v618_v19  ;;  %v1236_v11 = vsel %vm3972_vm4, %v2124_v59, 0.0  ;;  %v1219_v41 = vsel %vm3974_vm5, %v2107_v54, 0.0  ;;  %v3987_v13 = vld [vmem:[#allocation16_spill] sm:$0xff] }
 0x1fd   : > { %v632_v16 = vpop.xlane.xlu0 %631  ;;  %v887_v8 = vpop.xlane.xlu1 %886  ;;  %v1391_v17 = vpack.c.bf16 %v1236_v11, %v1235_v42  ;;  %1268 = vst.msk [vmem:[%s2474_s9 + $0xc8] sm:$0xff] %vm311_vm0, %v1236_v11  ;;  %1251 = vst.msk [vmem:[%s2474_s9 + $0x40] sm:$0xff] %vm311_vm0, %v1219_v41  ;;  %v905_v51 = vshll.u32 %v904_v47, 16  ;;  %vm3977_vm13 = vcmp.lt.s32.totalorder %v3976_v5, 600  ;;  %v650_v49 = vshll.u32 %v649_v35, 16  ;;  %v3989_v47 = vld [vmem:[#allocation23_spill] sm:$0xff] }
 0x1fe   : > { %vm978_vm8 = vcmp.eq.s32.totalorder %v3962_v33, %v876_v28  ;;  %vm961_vm6 = vcmp.eq.s32.totalorder %v3962_v33, %v621_v21  ;;  %v633_v18 = vcvt.f32.s32 %v632_v16  ;;  %v888_v31 = vcvt.f32.s32 %v887_v8  ;;  %v3991_v28 = vld [vmem:[#allocation11_spill] sm:$0xff]  ;;  %v3992_v11 = vld [vmem:[#allocation10_spill] sm:$0xff]  ;;  %v3997_v5 = vld [vmem:[#allocation12_spill] sm:$0xff] }
 0x1ff   : > { %v2125_v6 = vsel %vm978_vm8, 1.0, %v2406_v52  ;;  %v2108_v3 = vsel %vm961_vm6, 1.0, %v2406_v52  ;;  %1415 = vxpose.xlu0.c.b16.cont [5/8] (narrow) %v1391_v17, 32  ;;  %v664_v63 = vcvt.f32.s32 %v3979_v57  ;;  %v919_v27 = vcvt.f32.s32 %v3980_v39 }
 0x200   : > { %v636_v48 = vadd.s32 %v635_v26, %v633_v18  ;;  %v891_v32 = vadd.s32 %v890_v43, %v888_v31  ;;  %v1220_v58 = vsel %vm3977_vm13, %v2108_v3, 0.0  ;;  %v1237_v56 = vsel %vm1141_vm1, %v2125_v6, 0.0  ;;  %v3993_v31 = vld [vmem:[#allocation24_spill] sm:$0xff]  ;;  %v3995_v6 = vld [vmem:[#allocation17_spill] sm:$0xff] }
 0x201   : > { %v902_v55 = vpop.xlane.xlu0 %901  ;;  %v647_v30 = vpop.xlane.xlu1 %646  ;;  %v1383_v14 = vpack.c.bf16 %v1220_v58, %v1219_v41  ;;  %1252 = vst.msk [vmem:[%s2474_s9 + $0x48] sm:$0xff] %vm311_vm0, %v1220_v58  ;;  %1269 = vst.msk [vmem:[%s2474_s9 + $0xd0] sm:$0xff] %vm311_vm0, %v1237_v56  ;;  %v934_v37 = vcvt.f32.s32 %v3981_v2  ;;  %vm3983_vm1 = vcmp.lt.s32.totalorder %v3982_v53, 600  ;;  %vm3985_vm10 = vcmp.lt.s32.totalorder %v3984_v36, 600 }
 0x202   : > { %vm962_vm7 = vcmp.eq.s32.totalorder %v3962_v33, %v636_v48  ;;  %vm979_vm15 = vcmp.eq.s32.totalorder %v3962_v33, %v891_v32  ;;  %v903_v12 = vcvt.f32.s32 %v902_v55  ;;  %v648_v4 = vcvt.f32.s32 %v647_v30 }
 0x203   : > { %v2109_v34 = vsel %vm962_vm7, 1.0, %v2406_v52  ;;  %v2126_v29 = vsel %vm979_vm15, 1.0, %v2406_v52  ;;  %1399 = vxpose.xlu1.c.b16.cont [5/8] (narrow) %v1383_v14, 32  ;;  %v665_v62 = vshll.u32 %v664_v63, 16  ;;  %v920_v38 = vshll.u32 %v919_v27, 16  ;;  %v3998_v14 = vld [vmem:[#allocation18_spill] sm:$0xff] }
 0x204   : > { %v906_v20 = vadd.s32 %v905_v51, %v903_v12  ;;  %v651_v40 = vadd.s32 %v650_v49, %v648_v4  ;;  %v1238_v45 = vsel %vm3983_vm1, %v2126_v29, 0.0  ;;  %v1221_v46 = vsel %vm3985_vm10, %v2109_v34, 0.0 }
 0x205   : > { %v679_v23 = vcvt.f32.s32 %v3986_v25  ;;  %v662_v22 = vpop.xlane.xlu0 %661  ;;  %v917_v61 = vpop.xlane.xlu1 %916  ;;  %v1392_v44 = vpack.c.bf16 %v1238_v45, %v1237_v56  ;;  %1270 = vst.msk [vmem:[%s2474_s9 + $0xd8] sm:$0xff] %vm311_vm0, %v1238_v45  ;;  %1253 = vst.msk [vmem:[%s2474_s9 + $0x50] sm:$0xff] %vm311_vm0, %v1221_v46  ;;  %v935_v0 = vshll.u32 %v934_v37, 16  ;;  %vm3988_vm3 = vcmp.lt.s32.totalorder %v3987_v13, 600 }
 0x206   : > { %vm980_vm9 = vcmp.eq.s32.totalorder %v3962_v33, %v906_v20  ;;  %vm963_vm14 = vcmp.eq.s32.totalorder %v3962_v33, %v651_v40  ;;  %v663_v42 = vcvt.f32.s32 %v662_v22  ;;  %v918_v15 = vcvt.f32.s32 %v917_v61  ;;  %v4004_v22 = vld [vmem:[#allocation20_spill] sm:$0xff] }
 0x207   : > { %v2127_v24 = vsel %vm980_vm9, 1.0, %v2406_v52  ;;  %v2110_v9 = vsel %vm963_vm14, 1.0, %v2406_v52  ;;  %1416 = vxpose.xlu0.c.b16.cont [6/8] (narrow) %v1392_v44, 32  ;;  %vm3990_vm2 = vcmp.lt.s32.totalorder %v3989_v47, 600  ;;  %v680_v59 = vshll.u32 %v679_v23, 16 }
 0x208   : > { %v666_v1 = vadd.s32 %v665_v62, %v663_v42  ;;  %v921_v60 = vadd.s32 %v920_v38, %v918_v15  ;;  %v1222_v19 = vsel %vm3988_vm3, %v2110_v9, 0.0  ;;  %v1239_v54 = vsel %vm3990_vm2, %v2127_v24, 0.0  ;;  %v4002_v62 = vld [vmem:[#allocation19_spill] sm:$0xff]  ;;  %v1371_v9 = vld [vmem:[#allocation2] sm:$0xff] }
 0x209   : > { %v694_v21 = vcvt.f32.s32 %v3991_v28  ;;  %v949_v50 = vcvt.f32.s32 %v3992_v11  ;;  %v932_v41 = vpop.xlane.xlu0 %931  ;;  %v677_v26 = vpop.xlane.xlu1 %676  ;;  %v1384_v43 = vpack.c.bf16 %v1222_v19, %v1221_v46  ;;  %1254 = vst.msk [vmem:[%s2474_s9 + $0x58] sm:$0xff] %vm311_vm0, %v1222_v19  ;;  %1271 = vst.msk [vmem:[%s2474_s9 + $0xe0] sm:$0xff] %vm311_vm0, %v1239_v54  ;;  %vm3994_vm8 = vcmp.lt.s32.totalorder %v3993_v31, 600  ;;  %v1374_v19 = vld [vmem:[#allocation2 + $0x18] sm:$0xff]  ;;  %v1376_v11 = vld [vmem:[#allocation2 + $0x28] sm:$0xff] }
 0x20a   : > { %vm964_vm4 = vcmp.eq.s32.totalorder %v3962_v33, %v666_v1  ;;  %vm981_vm5 = vcmp.eq.s32.totalorder %v3962_v33, %v921_v60  ;;  %v933_v7 = vcvt.f32.s32 %v932_v41  ;;  %v678_v35 = vcvt.f32.s32 %v677_v26  ;;  %v1377_v26 = vld [vmem:[#allocation2 + $0x30] sm:$0xff] }
 0x20b   : > { %v2111_v16 = vsel %vm964_vm4, 1.0, %v2406_v52  ;;  %v2128_v8 = vsel %vm981_vm5, 1.0, %v2406_v52  ;;  %1400 = vxpose.xlu1.c.b16.cont [6/8] (narrow) %v1384_v43, 32  ;;  %vm3996_vm6 = vcmp.lt.s32.totalorder %v3995_v6, 600  ;;  %v695_v48 = vshll.u32 %v694_v21, 16 }
 0x20c   : > { %v936_v17 = vadd.s32 %v935_v0, %v933_v7  ;;  %v681_v18 = vadd.s32 %v680_v59, %v678_v35  ;;  %v1240_v51 = vsel %vm3994_vm8, %v2128_v8, 0.0  ;;  %v1223_v3 = vsel %vm3996_vm6, %v2111_v16, 0.0  ;;  %v1375_v59 = vld [vmem:[#allocation2 + $0x20] sm:$0xff]  ;;  %v1378_v35 = vld [vmem:[#allocation2 + $0x38] sm:$0xff] }
 0x20d   : > { %v950_v32 = vshll.u32 %v949_v50, 16  ;;  %v709_v58 = vcvt.f32.s32 %v3997_v5  ;;  %v692_v10 = vpop.xlane.xlu0 %691  ;;  %v947_v56 = vpop.xlane.xlu1 %946  ;;  %v1393_v49 = vpack.c.bf16 %v1240_v51, %v1239_v54  ;;  %1272 = vst.msk [vmem:[%s2474_s9 + $0xe8] sm:$0xff] %vm311_vm0, %v1240_v51  ;;  %1255 = vst.msk [vmem:[%s2474_s9 + $0x60] sm:$0xff] %vm311_vm0, %v1223_v3  ;;  %vm3999_vm15 = vcmp.lt.s32.totalorder %v3998_v14, 600 }
 0x20e   : > { %vm982_vm13 = vcmp.eq.s32.totalorder %v3962_v33, %v936_v17  ;;  %vm965_vm7 = vcmp.eq.s32.totalorder %v3962_v33, %v681_v18  ;;  %v693_v57 = vcvt.f32.s32 %v692_v10  ;;  %v948_v63 = vcvt.f32.s32 %v947_v56 }
 0x20f   : > { %v2129_v39 = vsel %vm982_vm13, 1.0, %v2406_v52  ;;  %v2112_v27 = vsel %vm965_vm7, 1.0, %v2406_v52  ;;  %1417 = vxpose.xlu0.c.b16.cont [7/8] (narrow) %v1393_v49, 32  ;;  %v710_v29 = vshll.u32 %v709_v58, 16  ;;  %vm4005_vm14 = vcmp.lt.s32.totalorder %v4004_v22, 600 }
 0x210   : > { %v696_v55 = vadd.s32 %v695_v48, %v693_v57  ;;  %v951_v30 = vadd.s32 %v950_v32, %v948_v63  ;;  %v1224_v12 = vsel %vm3999_vm15, %v2112_v27, 0.0  ;;  %v1241_v2 = vsel %vm1145_vm12, %v2129_v39, 0.0 }
 0x211   : > { %v707_v37 = vpop.xlane.xlu1 %706  ;;  %v1385_v34 = vpack.c.bf16 %v1224_v12, %v1223_v3  ;;  %1256 = vst.msk [vmem:[%s2474_s9 + $0x68] sm:$0xff] %vm311_vm0, %v1224_v12  ;;  %1273 = vst.msk [vmem:[%s2474_s9 + $0xf0] sm:$0xff] %vm311_vm0, %v1241_v2  ;;  %vm4003_vm12 = vcmp.lt.s32.totalorder %v4002_v62, 600  ;;  %v2407_v58 = vmov (!%p2164_p9), 0.0   ;;  %vm1704_vm13 = vcmask (!%p2164_p9), 7168  }
 0x212   : > { %vm966_vm1 = vcmp.eq.s32.totalorder %v3962_v33, %v696_v55  ;;  %vm983_vm10 = vcmp.eq.s32.totalorder %v3962_v33, %v951_v30  ;;  %v708_v20 = vcvt.f32.s32 %v707_v37 }
 0x213   : > { %v2113_v40 = vsel %vm966_vm1, 1.0, %v2406_v52  ;;  %v2130_v53 = vsel %vm983_vm10, 1.0, %v2406_v52  ;;  %1401 = vxpose.xlu1.c.b16.cont [7/8] (narrow) %v1385_v34, 32 }
 0x214   : > { %v711_v45 = vadd.s32 %v710_v29, %v708_v20  ;;  %v1242_v46 = vsel %vm1146_vm11, %v2130_v53, 0.0  ;;  %v1225_v38 = vsel %vm4003_vm12, %v2113_v40, 0.0 }
 0x215   : > { %v1394_v25 = vpack.c.bf16 %v1242_v46, %v1241_v2  ;;  %1274 = vst.msk [vmem:[%s2474_s9 + $0xf8] sm:$0xff] %vm311_vm0, %v1242_v46  ;;  %1257 = vst.msk [vmem:[%s2474_s9 + $0x70] sm:$0xff] %vm311_vm0, %v1225_v38 }
 0x216   : > { %vm967_vm9 = vcmp.eq.s32.totalorder %v3962_v33, %v711_v45  ;;  %v1372_v33 = vld [vmem:[#allocation2 + $0x8] sm:$0xff] }
 0x217   : > { %v2114_v23 = vsel %vm967_vm9, 1.0, %v2406_v52  ;;  %1418 = vxpose.xlu0.c.b16.end [8/8] (narrow) %v1394_v25, 32  ;;  %v1373_v52 = vld [vmem:[#allocation2 + $0x10] sm:$0xff] }
 0x218   : > { %v1226_v61 = vsel %vm4005_vm14, %v2114_v23, 0.0 }
 0x219   : > { %v1386_v44 = vpack.c.bf16 %v1226_v61, %v1225_v38  ;;  %1258 = vst.msk [vmem:[%s2474_s9 + $0x78] sm:$0xff] %vm311_vm0, %v1226_v61 }
 0x21b   : > { %1402 = vxpose.xlu1.c.b16.end [8/8] (narrow) %v1386_v44, 32 }
 0x261   : > { %v1419_v42 = vpop.trf.xlu0 }
 0x262   : > { %1619 = vmatprep.mubr.bf16.mxu0 %v1419_v42 }
 0x265   : > { %v1403_v15 = vpop.trf.xlu1  ;;  %v1420_v0 = vpop.trf.xlu0 }
 0x266   : > { %1620 = vmatmul.mubr.bf16.vlgmr.msra.gmra.mrb[0].mxu0 %v1403_v15  ;;  %1629 = vmatprep.mubr.bf16.mxu1 %v1420_v0 }
 0x269   : > { %v1404_v24 = vpop.trf.xlu1 }
 0x26a   : > { %1630 = vmatmul.mubr.bf16.vlgmr.msra.gmra.mrb[0].mxu1 %v1404_v24 }
 0x339   : > { %v1621_v1 = vpop.f32.mrb[0].mxu0 }
 0x33a   : > { %v1640_v60 = vadd.f32 %v1621_v1, %v1371_v9  ;;  %v1623_v13 = vpop.f32.mrb[1].mxu0 }
 0x33b   : > { %v1641_v47 = vadd.f32 %v1623_v13, %v1372_v33  ;;  %v1625_v54 = vpop.f32.mrb[2].mxu0 }
 0x33c   : > { %1648 = vst [vmem:[#allocation2] sm:$0xff] %v1640_v60  ;;  %v1642_v28 = vadd.f32 %v1625_v54, %v1373_v52  ;;  %v1627_v21 = vpop.f32.mrb[3].mxu0 }
 0x33d   : > { %1649 = vst [vmem:[#allocation2 + $0x8] sm:$0xff] %v1641_v47  ;;  %v1643_v50 = vadd.f32 %v1627_v21, %v1374_v19  ;;  %v1631_v41 = vpop.f32.mrb[0].mxu1  ;;  %1659 = sbr.rel (%p2164_p9) target bundleno = 1000 (0x3e8), region = 36 }
 0x33e   : > { %1650 = vst [vmem:[#allocation2 + $0x10] sm:$0xff] %v1642_v28  ;;  %v1644_v43 = vadd.f32 %v1631_v41, %v1375_v59  ;;  %v1633_v7 = vpop.f32.mrb[1].mxu1 }
 0x33f   : > { %1651 = vst [vmem:[#allocation2 + $0x18] sm:$0xff] %v1643_v50  ;;  %v1645_v16 = vadd.f32 %v1633_v7, %v1376_v11  ;;  %v1635_v8 = vpop.f32.mrb[2].mxu1 }
 0x340   : > { %1652 = vst [vmem:[#allocation2 + $0x20] sm:$0xff] %v1644_v43  ;;  %v1646_v17 = vadd.f32 %v1635_v8, %v1377_v26  ;;  %v1637_v18 = vpop.f32.mrb[3].mxu1 }
 0x341   : > { %1653 = vst [vmem:[#allocation2 + $0x28] sm:$0xff] %v1645_v16  ;;  %v1647_v31 = vadd.f32 %v1637_v18, %v1378_v35 }
 0x342   : > { %1654 = vst [vmem:[#allocation2 + $0x30] sm:$0xff] %v1646_v17 }
 0x343   : > { %1655 = vst [vmem:[#allocation2 + $0x38] sm:$0xff] %v1647_v31  ;;  %v1660_v3 = vld [vmem:[#allocation2] sm:$0xff] (!%p2164_p9) }
 0x344   : > { %v1661_v48 = vld [vmem:[#allocation2 + $0x8] sm:$0xff]  ;;  %vm1668_vm3 = vcmp.gt.f32.partialorder %v1660_v3, 0.0 }
 0x345   : > { %vm1669_vm2 = vcmp.gt.f32.partialorder %v1661_v48, 0.0  ;;  %v2165_v49 = vsel %vm1668_vm3, 1.0, %v2407_v58  ;;  %v1662_v57 = vld [vmem:[#allocation2 + $0x10] sm:$0xff]  ;;  %v1709_v29 = vadd.f32 %v1661_v48, %v1660_v3 }
 0x346   : > { %v1663_v63 = vld [vmem:[#allocation2 + $0x18] sm:$0xff]  ;;  %v2166_v27 = vsel %vm1669_vm2, 1.0, %v2407_v58  ;;  %vm1670_vm8 = vcmp.gt.f32.partialorder %v1662_v57, 0.0 }
 0x347   : > { %v1664_v51 = vld [vmem:[#allocation2 + $0x20] sm:$0xff]  ;;  %v1692_v55 = vadd.f32 %v2166_v27, %v2165_v49  ;;  %vm1671_vm6 = vcmp.gt.f32.partialorder %v1663_v63, 0.0  ;;  %v2167_v4 = vsel %vm1670_vm8, 1.0, %v2407_v58  ;;  %v1712_v34 = vadd.f32 %v1663_v63, %v1662_v57 }
 0x348   : > { %v1665_v6 = vld [vmem:[#allocation2 + $0x28] sm:$0xff]  ;;  %vm1672_vm0 = vcmp.gt.f32.partialorder %v1664_v51, 0.0  ;;  %v2168_v2 = vsel %vm1671_vm6, 1.0, %v2407_v58 }
 0x349   : > { %vm1673_vm11 = vcmp.gt.f32.partialorder %v1665_v6, 0.0  ;;  %v1666_v32 = vld [vmem:[#allocation2 + $0x30] sm:$0xff]  ;;  %v2169_v10 = vsel %vm1672_vm0, 1.0, %v2407_v58  ;;  %1693 = vadd.xlane.f32.xlu0 %v1692_v55  ;;  %v1695_v37 = vadd.f32 %v2168_v2, %v2167_v4  ;;  %v1715_v40 = vadd.f32 %v1665_v6, %v1664_v51 }
 0x34a   : > { %v1667_v5 = vld [vmem:[#allocation2 + $0x38] sm:$0xff]  ;;  %v2170_v56 = vsel %vm1673_vm11, 1.0, %v2407_v58  ;;  %vm1674_vm4 = vcmp.gt.f32.partialorder %v1666_v32, 0.0 }
 0x34b   : > { %v1698_v39 = vadd.f32 %v2170_v56, %v2169_v10  ;;  %vm1675_vm5 = vcmp.gt.f32.partialorder %v1667_v5, 0.0  ;;  %v2171_v30 = vsel %vm1674_vm4, 1.0, %v2407_v58  ;;  %v1718_v20 = vadd.f32 %v1667_v5, %v1666_v32 }
 0x34c   : > { %v2172_v14 = vsel %vm1675_vm5, 1.0, %v2407_v58 }
 0x34d   : > { %1699 = vadd.xlane.f32.xlu1 %v1698_v39  ;;  %v1701_v12 = vadd.f32 %v2172_v14, %v2171_v30  ;;  %1696 = vadd.xlane.f32.xlu0 %v1695_v37 }
 0x351   : > { %1702 = vadd.xlane.f32.xlu1 %v1701_v12  ;;  %1710 = vadd.xlane.f32.xlu0 %v1709_v29 }
 0x355   : > { %1713 = vadd.xlane.f32.xlu1 %v1712_v34  ;;  %1716 = vadd.xlane.f32.xlu0 %v1715_v40 }
 0x359   : > { %1719 = vadd.xlane.f32.xlu1 %v1718_v20 }
 0x3d6   : > { %v1694_v45 = vpop.xlane.xlu0 %1693 }
 0x3d7   : > { %1705 = vst.msk [vmem:[%s3838_s3] sm:$0xff] %vm1704_vm13, %v1694_v45 }
 0x3da   : > { %v1700_v53 = vpop.xlane.xlu1 %1699  ;;  %v1697_v46 = vpop.xlane.xlu0 %1696 }
 0x3db   : > { %1707 = vst.msk [vmem:[%s3838_s3 + $0x10] sm:$0xff] %vm1704_vm13, %v1700_v53  ;;  %1706 = vst.msk [vmem:[%s3838_s3 + $0x8] sm:$0xff] %vm1704_vm13, %v1697_v46 }
 0x3de   : > { %v1703_v36 = vpop.xlane.xlu1 %1702  ;;  %v1711_v38 = vpop.xlane.xlu0 %1710 }
 0x3df   : > { %1708 = vst.msk [vmem:[%s3838_s3 + $0x18] sm:$0xff] %vm1704_vm13, %v1703_v36  ;;  %1721 = vst.msk [vmem:[%s3839_s4] sm:$0xff] %vm1704_vm13, %v1711_v38 }
 0x3e2   : > { %v1714_v62 = vpop.xlane.xlu1 %1713  ;;  %v1717_v23 = vpop.xlane.xlu0 %1716 }
 0x3e3   : > { %1722 = vst.msk [vmem:[%s3839_s4 + $0x8] sm:$0xff] %vm1704_vm13, %v1714_v62  ;;  %1723 = vst.msk [vmem:[%s3839_s4 + $0x10] sm:$0xff] %vm1704_vm13, %v1717_v23 }
 0x3e6   : > { %v1720_v25 = vpop.xlane.xlu1 %1719 }
 0x3e7   : > { %1724 = vst.msk [vmem:[%s3839_s4 + $0x18] sm:$0xff] %vm1704_vm13, %v1720_v25 }
 0x3e8 PF: > { %1731 = sbr.rel (!%p2455_p4) target bundleno = 1063 (0x427), region = 40  ;;  %s1733_s7 = ssub.s32 (%p2455_p4), 75, %s2460_s25 }
 0x3e9   : > { %s3703_s12 = scalar_lea.vmem (%p2455_p4), %s3837_s2, %s2131_s10   ;;  %p1734_p10 = scmp.lt.s32.totalorder (%p2455_p4), %s1733_s7, 32 }
 0x3ef   : > { %s4015_s7 = smov (!%p1734_p10, %s1733_s7), 32 }
 0x3f0   : > { %s2175_s13 = sshll.u32 %s4015_s7, 7 }
 0x3f1   : > { %p2178_p11 = scmp.eq.s32.totalorder %s2175_s13, 0 }
 0x3f2   : > { %s3709_s14 = sshrl.u32 (!%p2178_p11), %s4015_s7, 5 }
 0x3f3   : > { %1742 = sbr.rel (%p2178_p11) target bundleno = 1063 (0x427), region = 44  ;;  %p2179_p12 = scmp.le.s32.totalorder (!%p2178_p11), %s3709_s14, 0 }
 0x3fa   : > { %2038 = sbr.rel (%p2179_p12) target bundleno = 1042 (0x412), region = 139  ;;  %s4006_s18 = smov (!%p2179_p12), %s3703_s12 }
 0x3fb   : > { %s4007_s23 = smov (!%p2179_p12), %s2474_s9  ;;  %s3718_s25 = smov (!%p2179_p12), 0  }
 0x3fc   : > { %s3720_s10 = smov (!%p2179_p12), 0  }
 0x401 LB: >> { %v1866_v22 = vld [vmem:[%s2379_s23] sm:$0xff]  ;;  %v1868_v61 = vld [vmem:[%s2379_s23 + $0x8] sm:$0xff]  ;;  %v1870_v44 = vld [vmem:[%s2379_s23 + $0x10] sm:$0xff]  ;;  %s1930_s15 = sadd.s32 1, %s2383_s25  ;;  %s1860_s10 = sadd.s32 1, %s2387_s10   ;;  %s2387_s10 = sphi %s3720_s10, %s1860_s10   ;;  %s2383_s25 = sphi %s3718_s25, %s4010_s25   ;;  %s2379_s23 = sphi %s4007_s23, %s4009_s23   ;;  %s2375_s18 = sphi %s4006_s18, %s4008_s18  }
 0x402   : >> { %1867 = vst [vmem:[%s2375_s18] sm:$0xff] %v1866_v22  ;;  %1869 = vst [vmem:[%s2375_s18 + $0x8] sm:$0xff] %v1868_v61  ;;  %v1872_v42 = vld [vmem:[%s2379_s23 + $0x18] sm:$0xff]  ;;  %v1874_v15 = vld [vmem:[%s2379_s23 + $0x20] sm:$0xff]  ;;  %p1931_p13 = scmp.ge.s32.totalorder %s1930_s15, %s3709_s14  ;;  %p1859_p0 = scmp.ge.s32.totalorder %s1860_s10, %s3709_s14 }
 0x403   : >> { %1871 = vst [vmem:[%s2375_s18 + $0x10] sm:$0xff] %v1870_v44  ;;  %v1876_v0 = vld [vmem:[%s2379_s23 + $0x28] sm:$0xff]  ;;  %1873 = vst [vmem:[%s2375_s18 + $0x18] sm:$0xff] %v1872_v42  ;;  %v1878_v24 = vld [vmem:[%s2379_s23 + $0x30] sm:$0xff] }
 0x404   : >> { %1875 = vst [vmem:[%s2375_s18 + $0x20] sm:$0xff] %v1874_v15  ;;  %1877 = vst [vmem:[%s2375_s18 + $0x28] sm:$0xff] %v1876_v0  ;;  %v1880_v9 = vld [vmem:[%s2379_s23 + $0x38] sm:$0xff]  ;;  %v1882_v33 = vld [vmem:[%s2379_s23 + $0x40] sm:$0xff]  ;;  %s4017_s15 = smov (%p1931_p13, %s1930_s15), 0 }
 0x405   : >> { %1879 = vst [vmem:[%s2375_s18 + $0x30] sm:$0xff] %v1878_v24  ;;  %1881 = vst [vmem:[%s2375_s18 + $0x38] sm:$0xff] %v1880_v9  ;;  %v1884_v1 = vld [vmem:[%s2379_s23 + $0x48] sm:$0xff]  ;;  %v1886_v52 = vld [vmem:[%s2379_s23 + $0x50] sm:$0xff]  ;;  %s2180_s17 = sshll.u32 %s4017_s15, 8  ;;  %s4010_s25 = smov %s4017_s15 }
 0x406   : >> { %1883 = vst [vmem:[%s2375_s18 + $0x40] sm:$0xff] %v1882_v33  ;;  %v1888_v60 = vld [vmem:[%s2379_s23 + $0x58] sm:$0xff]  ;;  %1885 = vst [vmem:[%s2375_s18 + $0x48] sm:$0xff] %v1884_v1  ;;  %v1890_v13 = vld [vmem:[%s2379_s23 + $0x60] sm:$0xff]  ;;  %s3776_s20 = scalar_lea.vmem %s2474_s9, %s2180_s17 [#allocation3]   ;;  %s1936_s21 = scalar_lea.vmem %s3703_s12, %s2180_s17  }
 0x407   : >> { %1887 = vst [vmem:[%s2375_s18 + $0x50] sm:$0xff] %v1886_v52  ;;  %1889 = vst [vmem:[%s2375_s18 + $0x58] sm:$0xff] %v1888_v60  ;;  %v1892_v19 = vld [vmem:[%s2379_s23 + $0x68] sm:$0xff]  ;;  %v1894_v47 = vld [vmem:[%s2379_s23 + $0x70] sm:$0xff] }
 0x408   : >> { %1891 = vst [vmem:[%s2375_s18 + $0x60] sm:$0xff] %v1890_v13  ;;  %1893 = vst [vmem:[%s2375_s18 + $0x68] sm:$0xff] %v1892_v19  ;;  %v1896_v54 = vld [vmem:[%s2379_s23 + $0x78] sm:$0xff]  ;;  %v1898_v59 = vld [vmem:[%s2379_s23 + $0x80] sm:$0xff] }
 0x409   : >> { %1895 = vst [vmem:[%s2375_s18 + $0x70] sm:$0xff] %v1894_v47  ;;  %v1900_v28 = vld [vmem:[%s2379_s23 + $0x88] sm:$0xff]  ;;  %1897 = vst [vmem:[%s2375_s18 + $0x78] sm:$0xff] %v1896_v54  ;;  %v1902_v21 = vld [vmem:[%s2379_s23 + $0x90] sm:$0xff] }
 0x40a   : >> { %1899 = vst [vmem:[%s2375_s18 + $0x80] sm:$0xff] %v1898_v59  ;;  %1901 = vst [vmem:[%s2375_s18 + $0x88] sm:$0xff] %v1900_v28  ;;  %v1904_v11 = vld [vmem:[%s2379_s23 + $0x98] sm:$0xff]  ;;  %v1906_v50 = vld [vmem:[%s2379_s23 + $0xa0] sm:$0xff] }
 0x40b   : >> { %1903 = vst [vmem:[%s2375_s18 + $0x90] sm:$0xff] %v1902_v21  ;;  %1905 = vst [vmem:[%s2375_s18 + $0x98] sm:$0xff] %v1904_v11  ;;  %v1908_v41 = vld [vmem:[%s2379_s23 + $0xa8] sm:$0xff]  ;;  %v1910_v26 = vld [vmem:[%s2379_s23 + $0xb0] sm:$0xff]  ;;  %1862 = sbr.rel (!%p1859_p0) target bundleno = 1025 (0x401), region = 145 }
 0x40c   : >> { %1907 = vst [vmem:[%s2375_s18 + $0xa0] sm:$0xff] %v1906_v50  ;;  %v1912_v43 = vld [vmem:[%s2379_s23 + $0xb8] sm:$0xff]  ;;  %1909 = vst [vmem:[%s2375_s18 + $0xa8] sm:$0xff] %v1908_v41  ;;  %v1914_v7 = vld [vmem:[%s2379_s23 + $0xc0] sm:$0xff] }
 0x40d   : >> { %1911 = vst [vmem:[%s2375_s18 + $0xb0] sm:$0xff] %v1910_v26  ;;  %1913 = vst [vmem:[%s2375_s18 + $0xb8] sm:$0xff] %v1912_v43  ;;  %v1916_v35 = vld [vmem:[%s2379_s23 + $0xc8] sm:$0xff]  ;;  %v1918_v16 = vld [vmem:[%s2379_s23 + $0xd0] sm:$0xff] }
 0x40e   : >> { %1915 = vst [vmem:[%s2375_s18 + $0xc0] sm:$0xff] %v1914_v7  ;;  %1917 = vst [vmem:[%s2375_s18 + $0xc8] sm:$0xff] %v1916_v35  ;;  %v1920_v8 = vld [vmem:[%s2379_s23 + $0xd8] sm:$0xff]  ;;  %v1922_v17 = vld [vmem:[%s2379_s23 + $0xe0] sm:$0xff] }
 0x40f   : >> { %1919 = vst [vmem:[%s2375_s18 + $0xd0] sm:$0xff] %v1918_v16  ;;  %v1924_v18 = vld [vmem:[%s2379_s23 + $0xe8] sm:$0xff]  ;;  %1921 = vst [vmem:[%s2375_s18 + $0xd8] sm:$0xff] %v1920_v8  ;;  %v1926_v31 = vld [vmem:[%s2379_s23 + $0xf0] sm:$0xff] }
 0x410   : >> { %1923 = vst [vmem:[%s2375_s18 + $0xe0] sm:$0xff] %v1922_v17  ;;  %1925 = vst [vmem:[%s2375_s18 + $0xe8] sm:$0xff] %v1924_v18  ;;  %v1928_v51 = vld [vmem:[%s2379_s23 + $0xf8] sm:$0xff]  ;;  %s4009_s23 = smov %s3776_s20 }
 0x411   : >> { %1927 = vst [vmem:[%s2375_s18 + $0xf0] sm:$0xff] %v1926_v31  ;;  %1929 = vst [vmem:[%s2375_s18 + $0xf8] sm:$0xff] %v1928_v51  ;;  %s4008_s18 = smov %s1936_s21 }
 0x412 PF: > { %s3817_s24 = sand.u32 31, %s4015_s7   ;;  %s2192_s26 = sshll.u32 %s3709_s14, 8 }
 0x413   : > { %s1941_s27 = scalar_lea.vmem %s2474_s9, %s2192_s26 [#allocation3]   ;;  %s1943_s28 = scalar_lea.vmem %s3703_s12, %s2192_s26  }
 0x414   : > { %p2185_p1 = scmp.le.s32.totalorder %s3817_s24, 0 }
 0x415   : > { %s2389_s29 = smov (!%p2185_p1), %s1943_s28   ;;  %s2393_s30 = smov (!%p2185_p1), %s1941_s27  }
 0x416   : > { %2052 = sbr.rel (%p2185_p1) target bundleno = 1063 (0x427), region = 150  ;;  %s2397_s5 = smov (!%p2185_p1), 0  }
 0x417   : > { %s2401_s6 = smov (!%p2185_p1), 0  }
 0x41d LB: >> { %v1953_v6 = vld [vmem:[%s2395_s30] sm:$0xff]  ;;  %s1955_s7 = sadd.s32 1, %s2399_s5  ;;  %s1947_s6 = sadd.s32 1, %s2403_s6   ;;  %s2403_s6 = sphi %s2401_s6, %s1947_s6   ;;  %s2399_s5 = sphi %s2397_s5, %s2398_s5   ;;  %s2395_s30 = sphi %s2393_s30, %s1960_s30   ;;  %s2391_s29 = sphi %s2389_s29, %s1961_s29  }
 0x41e   : >> { %1954 = vst [vmem:[%s2391_s29] sm:$0xff] %v1953_v6  ;;  %p1956_p2 = scmp.ge.s32.totalorder %s1955_s7, %s3817_s24  ;;  %p1946_p3 = scmp.ge.s32.totalorder %s1947_s6, %s3817_s24 }
 0x420   : >> { %s4019_s7 = smov (%p1956_p2, %s1955_s7), 0  ;;  %1949 = sbr.rel (!%p1946_p3) target bundleno = 1053 (0x41d), region = 156 }
 0x421   : >> { %s2186_s9 = sshll.u32 %s4019_s7, 3  ;;  %s2398_s5 = smov %s4019_s7  }
 0x422   : >> { %s1960_s30 = scalar_lea.vmem %s1941_s27, %s2186_s9 [#allocation3]   ;;  %s1961_s29 = scalar_lea.vmem %s1943_s28, %s2186_s9  }
 0x427 PF: > { %p12_p4 = scmp.ge.s32.totalorder %s2446_s19, 5   ;;  %s4011_s15 = smov %s2367_s16 }
 0x428   : > { %s4012_s16 = smov %s2453_s22  ;;  %s4013_s17 = smov %s2446_s19 }
 0x429   :  { %14 = sbr.rel (!%p12_p4) target bundleno = 2 (0x2), region = 167 }

</bundles_post_ra>
